<compile_context>
chip_gen: v5e
topology: v5e:2x2
jax: 0.10.0
libtpu: 0.0.40
codegen_flags: <defaults>
</compile_context>

<pallas_src>
import functools

import jax
import jax.numpy as jnp
from jax.experimental import pallas as pl


_NEG_SLOPE = 0.01  # nn.LeakyReLU default negative_slope


# ----------------------------------------------------------------------------
# Fused forward kernel factory.
# Ref order (inputs then outputs):
#   x_flat (T*B, I)  time-major flattened input (row = t*B + b)
#   h0     (L, B, H)
#   per GRU layer l: w_ir, w_iz, w_in, w_hr, w_hz, w_hn, b_r, b_z, b_in, b_hn
#   per MLP layer  : w, b
#   head           : wh (cols padded to 128), bh
#   outputs        : head_out ((B, Dp) or (T, B, Dp)), h_n (L, B, H)
# PyTorch GRU gate math (gate order r, z, n):
#   r = sigmoid(Wir x + Whr h + (bir+bhr))
#   z = sigmoid(Wiz x + Whz h + (biz+bhz))
#   n = tanh   (Win x + bin + r * (Whn h + bhn))
#   h' = (1 - z) * n + z * h
# ----------------------------------------------------------------------------
def _make_fused_kernel(T, B, H, L, n_mlp, return_sequences):
    def kernel(*refs):
        x_ref, h0_ref = refs[0], refs[1]
        gru_refs = [refs[2 + 10 * l: 2 + 10 * (l + 1)] for l in range(L)]
        base = 2 + 10 * L
        mlp_refs = refs[base: base + 2 * n_mlp]
        wh_ref, bh_ref = refs[base + 2 * n_mlp], refs[base + 2 * n_mlp + 1]
        head_ref, hn_ref = refs[base + 2 * n_mlp + 2], refs[base + 2 * n_mlp + 3]

        seq_flat = x_ref[...].astype(jnp.float32)      # (T*B, in_dim), row = t*B + b
        h = None
        for l in range(L):
            (wir, wiz, win, whr, whz, whn, br, bz, bin_, bhn) = gru_refs[l]
            # Hoisted input projections for the whole sequence (3 matmuls/layer).
            gi_r = jnp.dot(seq_flat, wir[...], preferred_element_type=jnp.float32) + br[...]
            gi_z = jnp.dot(seq_flat, wiz[...], preferred_element_type=jnp.float32) + bz[...]
            gi_n = jnp.dot(seq_flat, win[...], preferred_element_type=jnp.float32) + bin_[...]
            whr_v, whz_v, whn_v, bhn_v = whr[...], whz[...], whn[...], bhn[...]

            h = h0_ref[l].astype(jnp.float32)          # (B, H)
            need_seq = (l < L - 1) or return_sequences
            hs = []
            # Fully-unrolled static time loop: indices static, recurrence stays
            # in registers, no per-step grid / DMA overhead.
            for t in range(T):
                lo = t * B                              # B is a multiple of 8 -> aligned
                r = jax.nn.sigmoid(
                    gi_r[lo:lo + B]
                    + jnp.dot(h, whr_v, preferred_element_type=jnp.float32))
                z = jax.nn.sigmoid(
                    gi_z[lo:lo + B]
                    + jnp.dot(h, whz_v, preferred_element_type=jnp.float32))
                n = jnp.tanh(
                    gi_n[lo:lo + B]
                    + r * (jnp.dot(h, whn_v, preferred_element_type=jnp.float32) + bhn_v))
                h = (1.0 - z) * n + z * h
                if need_seq:
                    hs.append(h)
            hn_ref[l] = h.astype(hn_ref.dtype)          # epilogue write of h_n[l]
            if need_seq:
                seq_flat = jnp.concatenate(hs, axis=0)  # (T*B, H) for next layer / head

        # MLP trunk (LeakyReLU 0.01) + fused head.  With return_sequences=False
        # only the final hidden state goes through the head.
        a = seq_flat if return_sequences else h
        for i in range(n_mlp):
            a = (jnp.dot(a, mlp_refs[2 * i][...], preferred_element_type=jnp.float32)
                 + mlp_refs[2 * i + 1][...])
            a = jnp.where(a > 0, a, _NEG_SLOPE * a)
        out = jnp.dot(a, wh_ref[...], preferred_element_type=jnp.float32) + bh_ref[...]
        if return_sequences:
            head_ref[...] = out.reshape(T, B, -1)       # one lane-dense slab store
        else:
            head_ref[...] = out

    return kernel


# ----------------------------------------------------------------------------
# Parameter construction (same math / init scale as the PyTorch module, but
# laid out per-gate, with r/z biases pre-added and head columns lane-padded).
# ----------------------------------------------------------------------------
def _uniform(key, shape, scale):
    return jax.random.uniform(key, shape, jnp.float32, -scale, scale)


def init_params(key, input_size, hidden_size=32, num_gru_layers=1,
                linear_layers=(32, 32), num_peaks=3, single_raise=True):
    num_actions = 3 if single_raise else 5
    head_dim = num_actions + 3 * num_peaks
    head_pad = max(128, ((head_dim + 127) // 128) * 128)

    params = {"gru": [], "mlp": []}

    k_rec = float(hidden_size) ** -0.5
    for layer in range(num_gru_layers):
        in_dim = input_size if layer == 0 else hidden_size
        key, *ks = jax.random.split(key, 13)
        params["gru"].append({
            "w_ir": _uniform(ks[0], (in_dim, hidden_size), k_rec),
            "w_iz": _uniform(ks[1], (in_dim, hidden_size), k_rec),
            "w_in": _uniform(ks[2], (in_dim, hidden_size), k_rec),
            "w_hr": _uniform(ks[3], (hidden_size, hidden_size), k_rec),
            "w_hz": _uniform(ks[4], (hidden_size, hidden_size), k_rec),
            "w_hn": _uniform(ks[5], (hidden_size, hidden_size), k_rec),
            # b_r = b_ir + b_hr and b_z = b_iz + b_hz are only ever used summed.
            "b_r": _uniform(ks[6], (1, hidden_size), k_rec)
                   + _uniform(ks[7], (1, hidden_size), k_rec),
            "b_z": _uniform(ks[8], (1, hidden_size), k_rec)
                   + _uniform(ks[9], (1, hidden_size), k_rec),
            "b_in": _uniform(ks[10], (1, hidden_size), k_rec),
            "b_hn": _uniform(ks[11], (1, hidden_size), k_rec),
        })

    fan_in = hidden_size
    for width in linear_layers:
        kk = float(fan_in) ** -0.5
        key, kw, kb = jax.random.split(key, 3)
        params["mlp"].append({"w": _uniform(kw, (fan_in, width), kk),
                              "b": _uniform(kb, (1, width), kk)})
        fan_in = width

    kk = float(fan_in) ** -0.5
    key, kw, kb = jax.random.split(key, 3)
    wh = _uniform(kw, (fan_in, head_dim), kk)
    bh = _uniform(kb, (1, head_dim), kk)
    # Pad head columns to a full 128-lane tile; wrapper slices them back out.
    params["wh"] = jnp.pad(wh, ((0, 0), (0, head_pad - head_dim)))
    params["bh"] = jnp.pad(bh, ((0, 0), (0, head_pad - head_dim)))

    config = {"num_actions": num_actions, "num_peaks": num_peaks,
              "hidden_size": hidden_size, "num_gru_layers": num_gru_layers,
              "head_dim": head_dim}
    return params, config


# ----------------------------------------------------------------------------
# Forward wrapper (mirrors MixedGruPolicy.forward ->
# MixedGRUModule.forward(x, hidden, return_sequences, legal_actions_mask)).
# Static config (num_actions / num_peaks / return_sequences) is passed as
# static jit args; everything else is derived from array shapes.
# ----------------------------------------------------------------------------
@functools.partial(jax.jit,
                   static_argnames=("return_sequences", "num_actions", "num_peaks"))
def mixed_gru_policy_forward(params, x, hidden_state=None, return_sequences=False,
                             legal_actions_mask=None, num_actions=3, num_peaks=3):
    """
    x: (B, T, input_size) float32 (batch-first, like nn.GRU(batch_first=True)).
    hidden_state: (num_layers, B, H) or None (zeros, like .reset()).
    Returns (dist_params, h_n).
    """
    B, T, I = x.shape
    gru = params["gru"]
    L = len(gru)
    H = gru[-1]["w_hr"].shape[1]
    n_mlp = len(params["mlp"])
    head_dim = num_actions + 3 * num_peaks

    if hidden_state is None:
        hidden_state = jnp.zeros((L, B, H), jnp.float32)

    # Pad batch to a multiple of 8 sublanes so all per-timestep slices/stores
    # are sublane-aligned; padded rows are dropped after the kernel.
    Bp = max(8, -(-B // 8) * 8)
    xp = x.astype(jnp.float32)
    hp = hidden_state.astype(jnp.float32)
    if Bp != B:
        xp = jnp.pad(xp, ((0, Bp - B), (0, 0), (0, 0)))
        hp = jnp.pad(hp, ((0, 0), (0, Bp - B), (0, 0)))

    # Time-major flatten: row t*Bp + b  <->  x[b, t, :].
    x_flat = jnp.transpose(xp, (1, 0, 2)).reshape(T * Bp, I)

    args = [x_flat, hp]
    for g in gru:
        args += [g["w_ir"], g["w_iz"], g["w_in"], g["w_hr"], g["w_hz"], g["w_hn"],
                 g["b_r"], g["b_z"], g["b_in"], g["b_hn"]]
    for lyr in params["mlp"]:
        args += [lyr["w"], lyr["b"]]
    args += [params["wh"], params["bh"]]

    Dp = params["wh"].shape[1]
    head_shape = (T, Bp, Dp) if return_sequences else (Bp, Dp)

    head, h_n = pl.pallas_call(
        _make_fused_kernel(T, Bp, H, L, n_mlp, return_sequences),
        out_shape=(jax.ShapeDtypeStruct(head_shape, jnp.float32),
                   jax.ShapeDtypeStruct((L, Bp, H), jnp.float32)),
    )(*args)

    h_n = h_n[:, :B]
    if return_sequences:
        head = jnp.transpose(head, (1, 0, 2))[:B, :, :head_dim]   # (B, T, head_dim)
    else:
        head = head[:B, None, :head_dim]                          # (B, 1, head_dim)

    A, P = num_actions, num_peaks
    action_logits = head[..., :A]
    mix_logits = head[..., A:A + P]
    alpha_raw = head[..., A + P:A + 2 * P]
    beta_raw = head[..., A + 2 * P:A + 3 * P]

    if legal_actions_mask is not None:
        # NOTE: an all-False mask row degenerates to a uniform distribution over
        # the illegal actions (same behavior as a masked softmax in torch).
        action_logits = jnp.where(legal_actions_mask, action_logits, -1e30)

    # TODO(synk): MixedGRUModule head parameterization inferred (categorical
    # action head + Beta-mixture bet-fraction head); exact source not provided.
    dist_params = {
        "action_probs": jax.nn.softmax(action_logits, axis=-1),
        "mixture_weights": jax.nn.softmax(mix_logits, axis=-1),
        "alpha": jax.nn.softplus(alpha_raw) + 1.0,
        "beta": jax.nn.softplus(beta_raw) + 1.0,
    }
    return dist_params, h_n


# ----------------------------------------------------------------------------
# Pure-JAX (no Pallas) reference for correctness checking.
# ----------------------------------------------------------------------------
def _reference_forward(params, x, hidden_state, return_sequences,
                       legal_actions_mask, num_actions=3, num_peaks=3):
    B, T, _ = x.shape
    gru = params["gru"]
    L = len(gru)
    H = gru[-1]["w_hr"].shape[1]
    head_dim = num_actions + 3 * num_peaks
    hi = jax.lax.Precision.HIGHEST

    if hidden_state is None:
        hidden_state = jnp.zeros((L, B, H), jnp.float32)

    seq = x.astype(jnp.float32)
    h_n = []
    for l, g in enumerate(gru):
        h = hidden_state[l].astype(jnp.float32)
        outs = []
        for t in range(T):
            xt = seq[:, t, :]
            r = jax.nn.sigmoid(jnp.dot(xt, g["w_ir"], precision=hi)
                               + jnp.dot(h, g["w_hr"], precision=hi) + g["b_r"])
            z = jax.nn.sigmoid(jnp.dot(xt, g["w_iz"], precision=hi)
                               + jnp.dot(h, g["w_hz"], precision=hi) + g["b_z"])
            n = jnp.tanh(jnp.dot(xt, g["w_in"], precision=hi) + g["b_in"]
                         + r * (jnp.dot(h, g["w_hn"], precision=hi) + g["b_hn"]))
            h = (1.0 - z) * n + z * h
            outs.append(h)
        seq = jnp.stack(outs, axis=1)                  # (B, T, H)
        h_n.append(h)
    h_n = jnp.stack(h_n, axis=0)

    feats = seq if return_sequences else seq[:, -1:, :]
    a = feats
    for lyr in params["mlp"]:
        a = jnp.dot(a, lyr["w"], precision=hi) + lyr["b"]
        a = jnp.where(a > 0, a, _NEG_SLOPE * a)
    head = (jnp.dot(a, params["wh"], precision=hi) + params["bh"])[..., :head_dim]

    A, P = num_actions, num_peaks
    action_logits = head[..., :A]
    if legal_actions_mask is not None:
        action_logits = jnp.where(legal_actions_mask, action_logits, -1e30)
    dist_params = {
        "action_probs": jax.nn.softmax(action_logits, axis=-1),
        "mixture_weights": jax.nn.softmax(head[..., A:A + P], axis=-1),
        "alpha": jax.nn.softplus(head[..., A + P:A + 2 * P]) + 1.0,
        "beta": jax.nn.softplus(head[..., A + 2 * P:A + 3 * P]) + 1.0,
    }
    return dist_params, h_n


if __name__ == "__main__":
    key = jax.random.PRNGKey(0)
    k_p1, k_p2, k_x = jax.random.split(key, 3)

    B, T, INPUT_SIZE, HIDDEN = 2, 8, 16, 32
    x = jax.random.normal(k_x, (B, T, INPUT_SIZE), jnp.float32)

    # ---- config 1: 1 GRU layer, last-step head only, with an action mask ----
    params, cfg = init_params(k_p1, INPUT_SIZE, hidden_size=HIDDEN,
                              num_gru_layers=1, linear_layers=(32, 32),
                              num_peaks=3, single_raise=True)
    h0 = jnp.zeros((1, B, HIDDEN), jnp.float32)               # .reset()
    legal_mask = jnp.array([[[True, False, True]]])           # (1, 1, 3)

    dist, h_n = mixed_gru_policy_forward(params, x, h0,
                                         return_sequences=False,
                                         legal_actions_mask=legal_mask,
                                         num_actions=cfg["num_actions"],
                                         num_peaks=cfg["num_peaks"])
    jax.block_until_ready((dist, h_n))

    ref_dist, ref_hn = _reference_forward(params, x, h0, False, legal_mask,
                                          cfg["num_actions"], cfg["num_peaks"])
    for name in dist:
        assert jnp.allclose(dist[name], ref_dist[name], rtol=2e-2, atol=2e-3), name
    assert jnp.allclose(h_n, ref_hn, rtol=2e-2, atol=2e-3)

    assert dist["action_probs"].shape == (B, 1, 3)
    assert dist["mixture_weights"].shape == (B, 1, 3)
    assert dist["alpha"].shape == (B, 1, 3)
    assert h_n.shape == (1, B, HIDDEN)
    assert float(jnp.max(dist["action_probs"][..., 1])) < 1e-6   # masked action ~0

    # ---- config 2: 2 GRU layers, full-sequence head, no mask ----------------
    params2, cfg2 = init_params(k_p2, INPUT_SIZE, hidden_size=HIDDEN,
                                num_gru_layers=2, linear_layers=(32, 32),
                                num_peaks=3, single_raise=True)
    dist2, h_n2 = mixed_gru_policy_forward(params2, x, None,
                                           return_sequences=True,
                                           legal_actions_mask=None,
                                           num_actions=cfg2["num_actions"],
                                           num_peaks=cfg2["num_peaks"])
    jax.block_until_ready((dist2, h_n2))

    ref_dist2, ref_hn2 = _reference_forward(params2, x, None, True, None,
                                            cfg2["num_actions"], cfg2["num_peaks"])
    for name in dist2:
        assert jnp.allclose(dist2[name], ref_dist2[name], rtol=2e-2, atol=2e-3), name
    assert jnp.allclose(h_n2, ref_hn2, rtol=2e-2, atol=2e-3)
    assert dist2["action_probs"].shape == (B, T, 3)
    assert h_n2.shape == (2, B, HIDDEN)

    print("KERNEL_OK")
</pallas_src>

<mosaic_0001>
module attributes {stable_mosaic.version = 11 : i64} {
  func.func @kernel(%arg0: memref<64x16xf32, #tpu.memory_space<vmem>>, %arg1: memref<1x8x32xf32, #tpu.memory_space<vmem>>, %arg2: memref<16x32xf32, #tpu.memory_space<vmem>>, %arg3: memref<16x32xf32, #tpu.memory_space<vmem>>, %arg4: memref<16x32xf32, #tpu.memory_space<vmem>>, %arg5: memref<32x32xf32, #tpu.memory_space<vmem>>, %arg6: memref<32x32xf32, #tpu.memory_space<vmem>>, %arg7: memref<32x32xf32, #tpu.memory_space<vmem>>, %arg8: memref<1x32xf32, #tpu.memory_space<vmem>>, %arg9: memref<1x32xf32, #tpu.memory_space<vmem>>, %arg10: memref<1x32xf32, #tpu.memory_space<vmem>>, %arg11: memref<1x32xf32, #tpu.memory_space<vmem>>, %arg12: memref<32x32xf32, #tpu.memory_space<vmem>>, %arg13: memref<1x32xf32, #tpu.memory_space<vmem>>, %arg14: memref<32x32xf32, #tpu.memory_space<vmem>>, %arg15: memref<1x32xf32, #tpu.memory_space<vmem>>, %arg16: memref<32x128xf32, #tpu.memory_space<vmem>>, %arg17: memref<1x128xf32, #tpu.memory_space<vmem>>, %arg18: memref<8x128xf32, #tpu.memory_space<vmem>>, %arg19: memref<1x8x32xf32, #tpu.memory_space<vmem>>) attributes {dimension_semantics = [], scalar_prefetch = 0 : i64, scratch_operands = 0 : i64, tpu.core_type = #tpu.core_type<tc>} {
    %c0 = arith.constant 0 : index
    %c0_0 = arith.constant 0 : index
    %0 = vector.load %arg0[%c0, %c0_0] : memref<64x16xf32, #tpu.memory_space<vmem>>, vector<64x16xf32>
    %c0_1 = arith.constant 0 : index
    %c0_2 = arith.constant 0 : index
    %1 = vector.load %arg2[%c0_1, %c0_2] : memref<16x32xf32, #tpu.memory_space<vmem>>, vector<16x32xf32>
    %cst = arith.constant dense<0.000000e+00> : vector<64x32xf32>
    %2 = tpu.matmul %0, %1, %cst {dimension_numbers = #tpu.dot_dimension_numbers<[1], [0], [0], [1], [0, 0, 1, 1], [], []>} : vector<64x16xf32>, vector<16x32xf32>, vector<64x32xf32> -> vector<64x32xf32>
    %c0_3 = arith.constant 0 : index
    %c0_4 = arith.constant 0 : index
    %3 = vector.load %arg8[%c0_3, %c0_4] : memref<1x32xf32, #tpu.memory_space<vmem>>, vector<1x32xf32>
    %4 = vector.broadcast %3 : vector<1x32xf32> to vector<64x32xf32>
    %5 = arith.addf %2, %4 : vector<64x32xf32>
    %c0_5 = arith.constant 0 : index
    %c0_6 = arith.constant 0 : index
    %6 = vector.load %arg3[%c0_5, %c0_6] : memref<16x32xf32, #tpu.memory_space<vmem>>, vector<16x32xf32>
    %cst_7 = arith.constant dense<0.000000e+00> : vector<64x32xf32>
    %7 = tpu.matmul %0, %6, %cst_7 {dimension_numbers = #tpu.dot_dimension_numbers<[1], [0], [0], [1], [0, 0, 1, 1], [], []>} : vector<64x16xf32>, vector<16x32xf32>, vector<64x32xf32> -> vector<64x32xf32>
    %c0_8 = arith.constant 0 : index
    %c0_9 = arith.constant 0 : index
    %8 = vector.load %arg9[%c0_8, %c0_9] : memref<1x32xf32, #tpu.memory_space<vmem>>, vector<1x32xf32>
    %9 = vector.broadcast %8 : vector<1x32xf32> to vector<64x32xf32>
    %10 = arith.addf %7, %9 : vector<64x32xf32>
    %c0_10 = arith.constant 0 : index
    %c0_11 = arith.constant 0 : index
    %11 = vector.load %arg4[%c0_10, %c0_11] : memref<16x32xf32, #tpu.memory_space<vmem>>, vector<16x32xf32>
    %cst_12 = arith.constant dense<0.000000e+00> : vector<64x32xf32>
    %12 = tpu.matmul %0, %11, %cst_12 {dimension_numbers = #tpu.dot_dimension_numbers<[1], [0], [0], [1], [0, 0, 1, 1], [], []>} : vector<64x16xf32>, vector<16x32xf32>, vector<64x32xf32> -> vector<64x32xf32>
    %c0_13 = arith.constant 0 : index
    %c0_14 = arith.constant 0 : index
    %13 = vector.load %arg10[%c0_13, %c0_14] : memref<1x32xf32, #tpu.memory_space<vmem>>, vector<1x32xf32>
    %14 = vector.broadcast %13 : vector<1x32xf32> to vector<64x32xf32>
    %15 = arith.addf %12, %14 : vector<64x32xf32>
    %c0_15 = arith.constant 0 : index
    %c0_16 = arith.constant 0 : index
    %16 = vector.load %arg5[%c0_15, %c0_16] : memref<32x32xf32, #tpu.memory_space<vmem>>, vector<32x32xf32>
    %c0_17 = arith.constant 0 : index
    %c0_18 = arith.constant 0 : index
    %17 = vector.load %arg6[%c0_17, %c0_18] : memref<32x32xf32, #tpu.memory_space<vmem>>, vector<32x32xf32>
    %c0_19 = arith.constant 0 : index
    %c0_20 = arith.constant 0 : index
    %18 = vector.load %arg7[%c0_19, %c0_20] : memref<32x32xf32, #tpu.memory_space<vmem>>, vector<32x32xf32>
    %c0_21 = arith.constant 0 : index
    %c0_22 = arith.constant 0 : index
    %19 = vector.load %arg11[%c0_21, %c0_22] : memref<1x32xf32, #tpu.memory_space<vmem>>, vector<1x32xf32>
    %c0_23 = arith.constant 0 : index
    %c0_24 = arith.constant 0 : index
    %c0_25 = arith.constant 0 : index
    %20 = vector.load %arg1[%c0_23, %c0_24, %c0_25] : memref<1x8x32xf32, #tpu.memory_space<vmem>>, vector<1x8x32xf32>
    %21 = vector.shape_cast %20 : vector<1x8x32xf32> to vector<8x32xf32>
    %22 = vector.extract_strided_slice %5 {offsets = [0, 0], sizes = [8, 32], strides = [1, 1]} : vector<64x32xf32> to vector<8x32xf32>
    %cst_26 = arith.constant dense<0.000000e+00> : vector<8x32xf32>
    %23 = tpu.matmul %21, %16, %cst_26 {dimension_numbers = #tpu.dot_dimension_numbers<[1], [0], [0], [1], [0, 0, 1, 1], [], []>} : vector<8x32xf32>, vector<32x32xf32>, vector<8x32xf32> -> vector<8x32xf32>
    %24 = arith.addf %22, %23 : vector<8x32xf32>
    %25 = arith.negf %24 : vector<8x32xf32>
    %26 = math.exp %25 : vector<8x32xf32>
    %cst_27 = arith.constant 1.000000e+00 : f32
    %27 = vector.broadcast %cst_27 : f32 to vector<8x32xf32>
    %28 = arith.addf %27, %26 : vector<8x32xf32>
    %29 = arith.divf %27, %28 : vector<8x32xf32>
    %30 = vector.extract_strided_slice %10 {offsets = [0, 0], sizes = [8, 32], strides = [1, 1]} : vector<64x32xf32> to vector<8x32xf32>
    %cst_28 = arith.constant dense<0.000000e+00> : vector<8x32xf32>
    %31 = tpu.matmul %21, %17, %cst_28 {dimension_numbers = #tpu.dot_dimension_numbers<[1], [0], [0], [1], [0, 0, 1, 1], [], []>} : vector<8x32xf32>, vector<32x32xf32>, vector<8x32xf32> -> vector<8x32xf32>
    %32 = arith.addf %30, %31 : vector<8x32xf32>
    %33 = arith.negf %32 : vector<8x32xf32>
    %34 = math.exp %33 : vector<8x32xf32>
    %cst_29 = arith.constant 1.000000e+00 : f32
    %35 = vector.broadcast %cst_29 : f32 to vector<8x32xf32>
    %36 = arith.addf %35, %34 : vector<8x32xf32>
    %37 = arith.divf %35, %36 : vector<8x32xf32>
    %38 = vector.extract_strided_slice %15 {offsets = [0, 0], sizes = [8, 32], strides = [1, 1]} : vector<64x32xf32> to vector<8x32xf32>
    %cst_30 = arith.constant dense<0.000000e+00> : vector<8x32xf32>
    %39 = tpu.matmul %21, %18, %cst_30 {dimension_numbers = #tpu.dot_dimension_numbers<[1], [0], [0], [1], [0, 0, 1, 1], [], []>} : vector<8x32xf32>, vector<32x32xf32>, vector<8x32xf32> -> vector<8x32xf32>
    %40 = vector.broadcast %19 : vector<1x32xf32> to vector<8x32xf32>
    %41 = arith.addf %39, %40 : vector<8x32xf32>
    %42 = arith.mulf %29, %41 : vector<8x32xf32>
    %43 = arith.addf %38, %42 : vector<8x32xf32>
    %44 = math.tanh %43 : vector<8x32xf32>
    %cst_31 = arith.constant 1.000000e+00 : f32
    %45 = vector.broadcast %cst_31 : f32 to vector<8x32xf32>
    %46 = arith.subf %45, %37 : vector<8x32xf32>
    %47 = arith.mulf %46, %44 : vector<8x32xf32>
    %48 = arith.mulf %37, %21 : vector<8x32xf32>
    %49 = arith.addf %47, %48 : vector<8x32xf32>
    %50 = vector.extract_strided_slice %5 {offsets = [8, 0], sizes = [8, 32], strides = [1, 1]} : vector<64x32xf32> to vector<8x32xf32>
    %cst_32 = arith.constant dense<0.000000e+00> : vector<8x32xf32>
    %51 = tpu.matmul %49, %16, %cst_32 {dimension_numbers = #tpu.dot_dimension_numbers<[1], [0], [0], [1], [0, 0, 1, 1], [], []>} : vector<8x32xf32>, vector<32x32xf32>, vector<8x32xf32> -> vector<8x32xf32>
    %52 = arith.addf %50, %51 : vector<8x32xf32>
    %53 = arith.negf %52 : vector<8x32xf32>
    %54 = math.exp %53 : vector<8x32xf32>
    %cst_33 = arith.constant 1.000000e+00 : f32
    %55 = vector.broadcast %cst_33 : f32 to vector<8x32xf32>
    %56 = arith.addf %55, %54 : vector<8x32xf32>
    %57 = arith.divf %55, %56 : vector<8x32xf32>
    %58 = vector.extract_strided_slice %10 {offsets = [8, 0], sizes = [8, 32], strides = [1, 1]} : vector<64x32xf32> to vector<8x32xf32>
    %cst_34 = arith.constant dense<0.000000e+00> : vector<8x32xf32>
    %59 = tpu.matmul %49, %17, %cst_34 {dimension_numbers = #tpu.dot_dimension_numbers<[1], [0], [0], [1], [0, 0, 1, 1], [], []>} : vector<8x32xf32>, vector<32x32xf32>, vector<8x32xf32> -> vector<8x32xf32>
    %60 = arith.addf %58, %59 : vector<8x32xf32>
    %61 = arith.negf %60 : vector<8x32xf32>
    %62 = math.exp %61 : vector<8x32xf32>
    %cst_35 = arith.constant 1.000000e+00 : f32
    %63 = vector.broadcast %cst_35 : f32 to vector<8x32xf32>
    %64 = arith.addf %63, %62 : vector<8x32xf32>
    %65 = arith.divf %63, %64 : vector<8x32xf32>
    %66 = vector.extract_strided_slice %15 {offsets = [8, 0], sizes = [8, 32], strides = [1, 1]} : vector<64x32xf32> to vector<8x32xf32>
    %cst_36 = arith.constant dense<0.000000e+00> : vector<8x32xf32>
    %67 = tpu.matmul %49, %18, %cst_36 {dimension_numbers = #tpu.dot_dimension_numbers<[1], [0], [0], [1], [0, 0, 1, 1], [], []>} : vector<8x32xf32>, vector<32x32xf32>, vector<8x32xf32> -> vector<8x32xf32>
    %68 = vector.broadcast %19 : vector<1x32xf32> to vector<8x32xf32>
    %69 = arith.addf %67, %68 : vector<8x32xf32>
    %70 = arith.mulf %57, %69 : vector<8x32xf32>
    %71 = arith.addf %66, %70 : vector<8x32xf32>
    %72 = math.tanh %71 : vector<8x32xf32>
    %cst_37 = arith.constant 1.000000e+00 : f32
    %73 = vector.broadcast %cst_37 : f32 to vector<8x32xf32>
    %74 = arith.subf %73, %65 : vector<8x32xf32>
    %75 = arith.mulf %74, %72 : vector<8x32xf32>
    %76 = arith.mulf %65, %49 : vector<8x32xf32>
    %77 = arith.addf %75, %76 : vector<8x32xf32>
    %78 = vector.extract_strided_slice %5 {offsets = [16, 0], sizes = [8, 32], strides = [1, 1]} : vector<64x32xf32> to vector<8x32xf32>
    %cst_38 = arith.constant dense<0.000000e+00> : vector<8x32xf32>
    %79 = tpu.matmul %77, %16, %cst_38 {dimension_numbers = #tpu.dot_dimension_numbers<[1], [0], [0], [1], [0, 0, 1, 1], [], []>} : vector<8x32xf32>, vector<32x32xf32>, vector<8x32xf32> -> vector<8x32xf32>
    %80 = arith.addf %78, %79 : vector<8x32xf32>
    %81 = arith.negf %80 : vector<8x32xf32>
    %82 = math.exp %81 : vector<8x32xf32>
    %cst_39 = arith.constant 1.000000e+00 : f32
    %83 = vector.broadcast %cst_39 : f32 to vector<8x32xf32>
    %84 = arith.addf %83, %82 : vector<8x32xf32>
    %85 = arith.divf %83, %84 : vector<8x32xf32>
    %86 = vector.extract_strided_slice %10 {offsets = [16, 0], sizes = [8, 32], strides = [1, 1]} : vector<64x32xf32> to vector<8x32xf32>
    %cst_40 = arith.constant dense<0.000000e+00> : vector<8x32xf32>
    %87 = tpu.matmul %77, %17, %cst_40 {dimension_numbers = #tpu.dot_dimension_numbers<[1], [0], [0], [1], [0, 0, 1, 1], [], []>} : vector<8x32xf32>, vector<32x32xf32>, vector<8x32xf32> -> vector<8x32xf32>
    %88 = arith.addf %86, %87 : vector<8x32xf32>
    %89 = arith.negf %88 : vector<8x32xf32>
    %90 = math.exp %89 : vector<8x32xf32>
    %cst_41 = arith.constant 1.000000e+00 : f32
    %91 = vector.broadcast %cst_41 : f32 to vector<8x32xf32>
    %92 = arith.addf %91, %90 : vector<8x32xf32>
    %93 = arith.divf %91, %92 : vector<8x32xf32>
    %94 = vector.extract_strided_slice %15 {offsets = [16, 0], sizes = [8, 32], strides = [1, 1]} : vector<64x32xf32> to vector<8x32xf32>
    %cst_42 = arith.constant dense<0.000000e+00> : vector<8x32xf32>
    %95 = tpu.matmul %77, %18, %cst_42 {dimension_numbers = #tpu.dot_dimension_numbers<[1], [0], [0], [1], [0, 0, 1, 1], [], []>} : vector<8x32xf32>, vector<32x32xf32>, vector<8x32xf32> -> vector<8x32xf32>
    %96 = vector.broadcast %19 : vector<1x32xf32> to vector<8x32xf32>
    %97 = arith.addf %95, %96 : vector<8x32xf32>
    %98 = arith.mulf %85, %97 : vector<8x32xf32>
    %99 = arith.addf %94, %98 : vector<8x32xf32>
    %100 = math.tanh %99 : vector<8x32xf32>
    %cst_43 = arith.constant 1.000000e+00 : f32
    %101 = vector.broadcast %cst_43 : f32 to vector<8x32xf32>
    %102 = arith.subf %101, %93 : vector<8x32xf32>
    %103 = arith.mulf %102, %100 : vector<8x32xf32>
    %104 = arith.mulf %93, %77 : vector<8x32xf32>
    %105 = arith.addf %103, %104 : vector<8x32xf32>
    %106 = vector.extract_strided_slice %5 {offsets = [24, 0], sizes = [8, 32], strides = [1, 1]} : vector<64x32xf32> to vector<8x32xf32>
    %cst_44 = arith.constant dense<0.000000e+00> : vector<8x32xf32>
    %107 = tpu.matmul %105, %16, %cst_44 {dimension_numbers = #tpu.dot_dimension_numbers<[1], [0], [0], [1], [0, 0, 1, 1], [], []>} : vector<8x32xf32>, vector<32x32xf32>, vector<8x32xf32> -> vector<8x32xf32>
    %108 = arith.addf %106, %107 : vector<8x32xf32>
    %109 = arith.negf %108 : vector<8x32xf32>
    %110 = math.exp %109 : vector<8x32xf32>
    %cst_45 = arith.constant 1.000000e+00 : f32
    %111 = vector.broadcast %cst_45 : f32 to vector<8x32xf32>
    %112 = arith.addf %111, %110 : vector<8x32xf32>
    %113 = arith.divf %111, %112 : vector<8x32xf32>
    %114 = vector.extract_strided_slice %10 {offsets = [24, 0], sizes = [8, 32], strides = [1, 1]} : vector<64x32xf32> to vector<8x32xf32>
    %cst_46 = arith.constant dense<0.000000e+00> : vector<8x32xf32>
    %115 = tpu.matmul %105, %17, %cst_46 {dimension_numbers = #tpu.dot_dimension_numbers<[1], [0], [0], [1], [0, 0, 1, 1], [], []>} : vector<8x32xf32>, vector<32x32xf32>, vector<8x32xf32> -> vector<8x32xf32>
    %116 = arith.addf %114, %115 : vector<8x32xf32>
    %117 = arith.negf %116 : vector<8x32xf32>
    %118 = math.exp %117 : vector<8x32xf32>
    %cst_47 = arith.constant 1.000000e+00 : f32
    %119 = vector.broadcast %cst_47 : f32 to vector<8x32xf32>
    %120 = arith.addf %119, %118 : vector<8x32xf32>
    %121 = arith.divf %119, %120 : vector<8x32xf32>
    %122 = vector.extract_strided_slice %15 {offsets = [24, 0], sizes = [8, 32], strides = [1, 1]} : vector<64x32xf32> to vector<8x32xf32>
    %cst_48 = arith.constant dense<0.000000e+00> : vector<8x32xf32>
    %123 = tpu.matmul %105, %18, %cst_48 {dimension_numbers = #tpu.dot_dimension_numbers<[1], [0], [0], [1], [0, 0, 1, 1], [], []>} : vector<8x32xf32>, vector<32x32xf32>, vector<8x32xf32> -> vector<8x32xf32>
    %124 = vector.broadcast %19 : vector<1x32xf32> to vector<8x32xf32>
    %125 = arith.addf %123, %124 : vector<8x32xf32>
    %126 = arith.mulf %113, %125 : vector<8x32xf32>
    %127 = arith.addf %122, %126 : vector<8x32xf32>
    %128 = math.tanh %127 : vector<8x32xf32>
    %cst_49 = arith.constant 1.000000e+00 : f32
    %129 = vector.broadcast %cst_49 : f32 to vector<8x32xf32>
    %130 = arith.subf %129, %121 : vector<8x32xf32>
    %131 = arith.mulf %130, %128 : vector<8x32xf32>
    %132 = arith.mulf %121, %105 : vector<8x32xf32>
    %133 = arith.addf %131, %132 : vector<8x32xf32>
    %134 = vector.extract_strided_slice %5 {offsets = [32, 0], sizes = [8, 32], strides = [1, 1]} : vector<64x32xf32> to vector<8x32xf32>
    %cst_50 = arith.constant dense<0.000000e+00> : vector<8x32xf32>
    %135 = tpu.matmul %133, %16, %cst_50 {dimension_numbers = #tpu.dot_dimension_numbers<[1], [0], [0], [1], [0, 0, 1, 1], [], []>} : vector<8x32xf32>, vector<32x32xf32>, vector<8x32xf32> -> vector<8x32xf32>
    %136 = arith.addf %134, %135 : vector<8x32xf32>
    %137 = arith.negf %136 : vector<8x32xf32>
    %138 = math.exp %137 : vector<8x32xf32>
    %cst_51 = arith.constant 1.000000e+00 : f32
    %139 = vector.broadcast %cst_51 : f32 to vector<8x32xf32>
    %140 = arith.addf %139, %138 : vector<8x32xf32>
    %141 = arith.divf %139, %140 : vector<8x32xf32>
    %142 = vector.extract_strided_slice %10 {offsets = [32, 0], sizes = [8, 32], strides = [1, 1]} : vector<64x32xf32> to vector<8x32xf32>
    %cst_52 = arith.constant dense<0.000000e+00> : vector<8x32xf32>
    %143 = tpu.matmul %133, %17, %cst_52 {dimension_numbers = #tpu.dot_dimension_numbers<[1], [0], [0], [1], [0, 0, 1, 1], [], []>} : vector<8x32xf32>, vector<32x32xf32>, vector<8x32xf32> -> vector<8x32xf32>
    %144 = arith.addf %142, %143 : vector<8x32xf32>
    %145 = arith.negf %144 : vector<8x32xf32>
    %146 = math.exp %145 : vector<8x32xf32>
    %cst_53 = arith.constant 1.000000e+00 : f32
    %147 = vector.broadcast %cst_53 : f32 to vector<8x32xf32>
    %148 = arith.addf %147, %146 : vector<8x32xf32>
    %149 = arith.divf %147, %148 : vector<8x32xf32>
    %150 = vector.extract_strided_slice %15 {offsets = [32, 0], sizes = [8, 32], strides = [1, 1]} : vector<64x32xf32> to vector<8x32xf32>
    %cst_54 = arith.constant dense<0.000000e+00> : vector<8x32xf32>
    %151 = tpu.matmul %133, %18, %cst_54 {dimension_numbers = #tpu.dot_dimension_numbers<[1], [0], [0], [1], [0, 0, 1, 1], [], []>} : vector<8x32xf32>, vector<32x32xf32>, vector<8x32xf32> -> vector<8x32xf32>
    %152 = vector.broadcast %19 : vector<1x32xf32> to vector<8x32xf32>
    %153 = arith.addf %151, %152 : vector<8x32xf32>
    %154 = arith.mulf %141, %153 : vector<8x32xf32>
    %155 = arith.addf %150, %154 : vector<8x32xf32>
    %156 = math.tanh %155 : vector<8x32xf32>
    %cst_55 = arith.constant 1.000000e+00 : f32
    %157 = vector.broadcast %cst_55 : f32 to vector<8x32xf32>
    %158 = arith.subf %157, %149 : vector<8x32xf32>
    %159 = arith.mulf %158, %156 : vector<8x32xf32>
    %160 = arith.mulf %149, %133 : vector<8x32xf32>
    %161 = arith.addf %159, %160 : vector<8x32xf32>
    %162 = vector.extract_strided_slice %5 {offsets = [40, 0], sizes = [8, 32], strides = [1, 1]} : vector<64x32xf32> to vector<8x32xf32>
    %cst_56 = arith.constant dense<0.000000e+00> : vector<8x32xf32>
    %163 = tpu.matmul %161, %16, %cst_56 {dimension_numbers = #tpu.dot_dimension_numbers<[1], [0], [0], [1], [0, 0, 1, 1], [], []>} : vector<8x32xf32>, vector<32x32xf32>, vector<8x32xf32> -> vector<8x32xf32>
    %164 = arith.addf %162, %163 : vector<8x32xf32>
    %165 = arith.negf %164 : vector<8x32xf32>
    %166 = math.exp %165 : vector<8x32xf32>
    %cst_57 = arith.constant 1.000000e+00 : f32
    %167 = vector.broadcast %cst_57 : f32 to vector<8x32xf32>
    %168 = arith.addf %167, %166 : vector<8x32xf32>
    %169 = arith.divf %167, %168 : vector<8x32xf32>
    %170 = vector.extract_strided_slice %10 {offsets = [40, 0], sizes = [8, 32], strides = [1, 1]} : vector<64x32xf32> to vector<8x32xf32>
    %cst_58 = arith.constant dense<0.000000e+00> : vector<8x32xf32>
    %171 = tpu.matmul %161, %17, %cst_58 {dimension_numbers = #tpu.dot_dimension_numbers<[1], [0], [0], [1], [0, 0, 1, 1], [], []>} : vector<8x32xf32>, vector<32x32xf32>, vector<8x32xf32> -> vector<8x32xf32>
    %172 = arith.addf %170, %171 : vector<8x32xf32>
    %173 = arith.negf %172 : vector<8x32xf32>
    %174 = math.exp %173 : vector<8x32xf32>
    %cst_59 = arith.constant 1.000000e+00 : f32
    %175 = vector.broadcast %cst_59 : f32 to vector<8x32xf32>
    %176 = arith.addf %175, %174 : vector<8x32xf32>
    %177 = arith.divf %175, %176 : vector<8x32xf32>
    %178 = vector.extract_strided_slice %15 {offsets = [40, 0], sizes = [8, 32], strides = [1, 1]} : vector<64x32xf32> to vector<8x32xf32>
    %cst_60 = arith.constant dense<0.000000e+00> : vector<8x32xf32>
    %179 = tpu.matmul %161, %18, %cst_60 {dimension_numbers = #tpu.dot_dimension_numbers<[1], [0], [0], [1], [0, 0, 1, 1], [], []>} : vector<8x32xf32>, vector<32x32xf32>, vector<8x32xf32> -> vector<8x32xf32>
    %180 = vector.broadcast %19 : vector<1x32xf32> to vector<8x32xf32>
    %181 = arith.addf %179, %180 : vector<8x32xf32>
    %182 = arith.mulf %169, %181 : vector<8x32xf32>
    %183 = arith.addf %178, %182 : vector<8x32xf32>
    %184 = math.tanh %183 : vector<8x32xf32>
    %cst_61 = arith.constant 1.000000e+00 : f32
    %185 = vector.broadcast %cst_61 : f32 to vector<8x32xf32>
    %186 = arith.subf %185, %177 : vector<8x32xf32>
    %187 = arith.mulf %186, %184 : vector<8x32xf32>
    %188 = arith.mulf %177, %161 : vector<8x32xf32>
    %189 = arith.addf %187, %188 : vector<8x32xf32>
    %190 = vector.extract_strided_slice %5 {offsets = [48, 0], sizes = [8, 32], strides = [1, 1]} : vector<64x32xf32> to vector<8x32xf32>
    %cst_62 = arith.constant dense<0.000000e+00> : vector<8x32xf32>
    %191 = tpu.matmul %189, %16, %cst_62 {dimension_numbers = #tpu.dot_dimension_numbers<[1], [0], [0], [1], [0, 0, 1, 1], [], []>} : vector<8x32xf32>, vector<32x32xf32>, vector<8x32xf32> -> vector<8x32xf32>
    %192 = arith.addf %190, %191 : vector<8x32xf32>
    %193 = arith.negf %192 : vector<8x32xf32>
    %194 = math.exp %193 : vector<8x32xf32>
    %cst_63 = arith.constant 1.000000e+00 : f32
    %195 = vector.broadcast %cst_63 : f32 to vector<8x32xf32>
    %196 = arith.addf %195, %194 : vector<8x32xf32>
    %197 = arith.divf %195, %196 : vector<8x32xf32>
    %198 = vector.extract_strided_slice %10 {offsets = [48, 0], sizes = [8, 32], strides = [1, 1]} : vector<64x32xf32> to vector<8x32xf32>
    %cst_64 = arith.constant dense<0.000000e+00> : vector<8x32xf32>
    %199 = tpu.matmul %189, %17, %cst_64 {dimension_numbers = #tpu.dot_dimension_numbers<[1], [0], [0], [1], [0, 0, 1, 1], [], []>} : vector<8x32xf32>, vector<32x32xf32>, vector<8x32xf32> -> vector<8x32xf32>
    %200 = arith.addf %198, %199 : vector<8x32xf32>
    %201 = arith.negf %200 : vector<8x32xf32>
    %202 = math.exp %201 : vector<8x32xf32>
    %cst_65 = arith.constant 1.000000e+00 : f32
    %203 = vector.broadcast %cst_65 : f32 to vector<8x32xf32>
    %204 = arith.addf %203, %202 : vector<8x32xf32>
    %205 = arith.divf %203, %204 : vector<8x32xf32>
    %206 = vector.extract_strided_slice %15 {offsets = [48, 0], sizes = [8, 32], strides = [1, 1]} : vector<64x32xf32> to vector<8x32xf32>
    %cst_66 = arith.constant dense<0.000000e+00> : vector<8x32xf32>
    %207 = tpu.matmul %189, %18, %cst_66 {dimension_numbers = #tpu.dot_dimension_numbers<[1], [0], [0], [1], [0, 0, 1, 1], [], []>} : vector<8x32xf32>, vector<32x32xf32>, vector<8x32xf32> -> vector<8x32xf32>
    %208 = vector.broadcast %19 : vector<1x32xf32> to vector<8x32xf32>
    %209 = arith.addf %207, %208 : vector<8x32xf32>
    %210 = arith.mulf %197, %209 : vector<8x32xf32>
    %211 = arith.addf %206, %210 : vector<8x32xf32>
    %212 = math.tanh %211 : vector<8x32xf32>
    %cst_67 = arith.constant 1.000000e+00 : f32
    %213 = vector.broadcast %cst_67 : f32 to vector<8x32xf32>
    %214 = arith.subf %213, %205 : vector<8x32xf32>
    %215 = arith.mulf %214, %212 : vector<8x32xf32>
    %216 = arith.mulf %205, %189 : vector<8x32xf32>
    %217 = arith.addf %215, %216 : vector<8x32xf32>
    %218 = vector.extract_strided_slice %5 {offsets = [56, 0], sizes = [8, 32], strides = [1, 1]} : vector<64x32xf32> to vector<8x32xf32>
    %cst_68 = arith.constant dense<0.000000e+00> : vector<8x32xf32>
    %219 = tpu.matmul %217, %16, %cst_68 {dimension_numbers = #tpu.dot_dimension_numbers<[1], [0], [0], [1], [0, 0, 1, 1], [], []>} : vector<8x32xf32>, vector<32x32xf32>, vector<8x32xf32> -> vector<8x32xf32>
    %220 = arith.addf %218, %219 : vector<8x32xf32>
    %221 = arith.negf %220 : vector<8x32xf32>
    %222 = math.exp %221 : vector<8x32xf32>
    %cst_69 = arith.constant 1.000000e+00 : f32
    %223 = vector.broadcast %cst_69 : f32 to vector<8x32xf32>
    %224 = arith.addf %223, %222 : vector<8x32xf32>
    %225 = arith.divf %223, %224 : vector<8x32xf32>
    %226 = vector.extract_strided_slice %10 {offsets = [56, 0], sizes = [8, 32], strides = [1, 1]} : vector<64x32xf32> to vector<8x32xf32>
    %cst_70 = arith.constant dense<0.000000e+00> : vector<8x32xf32>
    %227 = tpu.matmul %217, %17, %cst_70 {dimension_numbers = #tpu.dot_dimension_numbers<[1], [0], [0], [1], [0, 0, 1, 1], [], []>} : vector<8x32xf32>, vector<32x32xf32>, vector<8x32xf32> -> vector<8x32xf32>
    %228 = arith.addf %226, %227 : vector<8x32xf32>
    %229 = arith.negf %228 : vector<8x32xf32>
    %230 = math.exp %229 : vector<8x32xf32>
    %cst_71 = arith.constant 1.000000e+00 : f32
    %231 = vector.broadcast %cst_71 : f32 to vector<8x32xf32>
    %232 = arith.addf %231, %230 : vector<8x32xf32>
    %233 = arith.divf %231, %232 : vector<8x32xf32>
    %234 = vector.extract_strided_slice %15 {offsets = [56, 0], sizes = [8, 32], strides = [1, 1]} : vector<64x32xf32> to vector<8x32xf32>
    %cst_72 = arith.constant dense<0.000000e+00> : vector<8x32xf32>
    %235 = tpu.matmul %217, %18, %cst_72 {dimension_numbers = #tpu.dot_dimension_numbers<[1], [0], [0], [1], [0, 0, 1, 1], [], []>} : vector<8x32xf32>, vector<32x32xf32>, vector<8x32xf32> -> vector<8x32xf32>
    %236 = vector.broadcast %19 : vector<1x32xf32> to vector<8x32xf32>
    %237 = arith.addf %235, %236 : vector<8x32xf32>
    %238 = arith.mulf %225, %237 : vector<8x32xf32>
    %239 = arith.addf %234, %238 : vector<8x32xf32>
    %240 = math.tanh %239 : vector<8x32xf32>
    %cst_73 = arith.constant 1.000000e+00 : f32
    %241 = vector.broadcast %cst_73 : f32 to vector<8x32xf32>
    %242 = arith.subf %241, %233 : vector<8x32xf32>
    %243 = arith.mulf %242, %240 : vector<8x32xf32>
    %244 = arith.mulf %233, %217 : vector<8x32xf32>
    %245 = arith.addf %243, %244 : vector<8x32xf32>
    %c0_74 = arith.constant 0 : index
    %c0_75 = arith.constant 0 : index
    %c0_76 = arith.constant 0 : index
    %246 = vector.load %arg19[%c0_74, %c0_75, %c0_76] : memref<1x8x32xf32, #tpu.memory_space<vmem>>, vector<1x8x32xf32>
    %247 = vector.shape_cast %246 : vector<1x8x32xf32> to vector<8x32xf32>
    %248 = vector.shape_cast %245 : vector<8x32xf32> to vector<1x8x32xf32>
    tpu.vector_store %arg19[%c0_74, %c0_75, %c0_76], %248 {strides = array<i32>} : memref<1x8x32xf32, #tpu.memory_space<vmem>>, vector<1x8x32xf32>,
    %c0_77 = arith.constant 0 : index
    %c0_78 = arith.constant 0 : index
    %249 = vector.load %arg12[%c0_77, %c0_78] : memref<32x32xf32, #tpu.memory_space<vmem>>, vector<32x32xf32>
    %cst_79 = arith.constant dense<0.000000e+00> : vector<8x32xf32>
    %250 = tpu.matmul %245, %249, %cst_79 {dimension_numbers = #tpu.dot_dimension_numbers<[1], [0], [0], [1], [0, 0, 1, 1], [], []>} : vector<8x32xf32>, vector<32x32xf32>, vector<8x32xf32> -> vector<8x32xf32>
    %c0_80 = arith.constant 0 : index
    %c0_81 = arith.constant 0 : index
    %251 = vector.load %arg13[%c0_80, %c0_81] : memref<1x32xf32, #tpu.memory_space<vmem>>, vector<1x32xf32>
    %252 = vector.broadcast %251 : vector<1x32xf32> to vector<8x32xf32>
    %253 = arith.addf %250, %252 : vector<8x32xf32>
    %cst_82 = arith.constant 0.000000e+00 : f32
    %254 = vector.broadcast %cst_82 : f32 to vector<8x32xf32>
    %255 = arith.cmpf ogt, %253, %254 : vector<8x32xf32>
    %cst_83 = arith.constant 0.00999999977 : f32
    %256 = vector.broadcast %cst_83 : f32 to vector<8x32xf32>
    %257 = arith.mulf %256, %253 : vector<8x32xf32>
    %258 = arith.select %255, %253, %257 : vector<8x32xi1>, vector<8x32xf32>
    %c0_84 = arith.constant 0 : index
    %c0_85 = arith.constant 0 : index
    %259 = vector.load %arg14[%c0_84, %c0_85] : memref<32x32xf32, #tpu.memory_space<vmem>>, vector<32x32xf32>
    %cst_86 = arith.constant dense<0.000000e+00> : vector<8x32xf32>
    %260 = tpu.matmul %258, %259, %cst_86 {dimension_numbers = #tpu.dot_dimension_numbers<[1], [0], [0], [1], [0, 0, 1, 1], [], []>} : vector<8x32xf32>, vector<32x32xf32>, vector<8x32xf32> -> vector<8x32xf32>
    %c0_87 = arith.constant 0 : index
    %c0_88 = arith.constant 0 : index
    %261 = vector.load %arg15[%c0_87, %c0_88] : memref<1x32xf32, #tpu.memory_space<vmem>>, vector<1x32xf32>
    %262 = vector.broadcast %261 : vector<1x32xf32> to vector<8x32xf32>
    %263 = arith.addf %260, %262 : vector<8x32xf32>
    %cst_89 = arith.constant 0.000000e+00 : f32
    %264 = vector.broadcast %cst_89 : f32 to vector<8x32xf32>
    %265 = arith.cmpf ogt, %263, %264 : vector<8x32xf32>
    %cst_90 = arith.constant 0.00999999977 : f32
    %266 = vector.broadcast %cst_90 : f32 to vector<8x32xf32>
    %267 = arith.mulf %266, %263 : vector<8x32xf32>
    %268 = arith.select %265, %263, %267 : vector<8x32xi1>, vector<8x32xf32>
    %c0_91 = arith.constant 0 : index
    %c0_92 = arith.constant 0 : index
    %269 = vector.load %arg16[%c0_91, %c0_92] : memref<32x128xf32, #tpu.memory_space<vmem>>, vector<32x128xf32>
    %cst_93 = arith.constant dense<0.000000e+00> : vector<8x128xf32>
    %270 = tpu.matmul %268, %269, %cst_93 {dimension_numbers = #tpu.dot_dimension_numbers<[1], [0], [0], [1], [0, 0, 1, 1], [], []>} : vector<8x32xf32>, vector<32x128xf32>, vector<8x128xf32> -> vector<8x128xf32>
    %c0_94 = arith.constant 0 : index
    %c0_95 = arith.constant 0 : index
    %271 = vector.load %arg17[%c0_94, %c0_95] : memref<1x128xf32, #tpu.memory_space<vmem>>, vector<1x128xf32>
    %272 = vector.broadcast %271 : vector<1x128xf32> to vector<8x128xf32>
    %273 = arith.addf %270, %272 : vector<8x128xf32>
    %c0_96 = arith.constant 0 : index
    %c0_97 = arith.constant 0 : index
    %274 = vector.load %arg18[%c0_96, %c0_97] : memref<8x128xf32, #tpu.memory_space<vmem>>, vector<8x128xf32>
    tpu.vector_store %arg18[%c0_96, %c0_97], %273 {strides = array<i32>} : memref<8x128xf32, #tpu.memory_space<vmem>>, vector<8x128xf32>,
    return
  }
}

</mosaic_0001>

<bundles_post_ra>
// kernel: mixed_gru_policy_forward.1
= control target key start
LH: loop header
LB: loop body
LE: loop exit
PB: predicated region body
PF: predicated region fallthrough
CT: control target
= control target key end

     0   :  { %s2027_s0 = inlined_call_operand.vmem [shape: f32[64,16], index: 0, kind: input, shape index: {}]   ;;  %s2028_s1 = inlined_call_operand.vmem [shape: f32[1,8,32], index: 1, kind: input, shape index: {}]   ;;  %s2029_s2 = inlined_call_operand.vmem [shape: f32[16,32], index: 2, kind: input, shape index: {}]   ;;  %s2030_s3 = inlined_call_operand.hbm [shape: f32[16,32], index: 3, kind: input, shape index: {}]   ;;  %s2031_s4 = inlined_call_operand.hbm [shape: f32[16,32], index: 4, kind: input, shape index: {}]   ;;  %s2032_s5 = inlined_call_operand.vmem [shape: f32[32,32], index: 5, kind: input, shape index: {}]   ;;  %s2033_s6 = inlined_call_operand.vmem [shape: f32[32,32], index: 6, kind: input, shape index: {}]   ;;  %s2034_s7 = inlined_call_operand.vmem [shape: f32[32,32], index: 7, kind: input, shape index: {}]   ;;  %s2035_s8 = inlined_call_operand.vmem [shape: f32[1,32], index: 8, kind: input, shape index: {}]   ;;  %s2036_s9 = inlined_call_operand.vmem [shape: f32[1,32], index: 9, kind: input, shape index: {}]   ;;  %s2037_s10 = inlined_call_operand.vmem [shape: f32[1,32], index: 10, kind: input, shape index: {}]   ;;  %s2038_s11 = inlined_call_operand.vmem [shape: f32[1,32], index: 11, kind: input, shape index: {}]   ;;  %s2039_s12 = inlined_call_operand.vmem [shape: f32[32,32], index: 12, kind: input, shape index: {}]   ;;  %s2040_s13 = inlined_call_operand.vmem [shape: f32[1,32], index: 13, kind: input, shape index: {}]   ;;  %s2041_s14 = inlined_call_operand.vmem [shape: f32[32,32], index: 14, kind: input, shape index: {}]   ;;  %s2042_s15 = inlined_call_operand.vmem [shape: f32[1,32], index: 15, kind: input, shape index: {}]   ;;  %s2043_s16 = inlined_call_operand.vmem [shape: f32[32,128], index: 16, kind: input, shape index: {}]   ;;  %s2044_s17 = inlined_call_operand.vmem [shape: f32[1,128], index: 17, kind: input, shape index: {}]   ;;  %s2045_s18 = inlined_call_operand.vmem [shape: f32[8,128], index: 18, kind: output, shape index: {0}]   ;;  %s2046_s19 = inlined_call_operand.vmem [shape: f32[1,8,32], index: 19, kind: output, shape index: {1}]  }
   0x1   :  { %2049 = sst [smem:[#allocation8_spill]] %s2027_s0 }
   0x2   :  { %2050 = sst [smem:[#allocation9_spill]] %s2028_s1 }
   0x3   :  { %2051 = sst [smem:[#allocation10_spill]] %s2029_s2 }
   0x4   :  { %2052 = sst [smem:[#allocation11_spill]] %s2030_s3 }
   0x5   :  { %25 = vsyncpa [#allocation3], 0  ;;  %s2053_s20 = sld [smem:[#allocation11_spill]] }
   0xb   :  { %s37_s21 = sshll.u32 %s2053_s20, 4  ;;  %s38_s21 = int_to_ptr.hbm [resolvable:$true] %s37_s21 }
   0xc   :  { %26 = vsyncpa [#allocation5], 0  ;;  %s1490_s1 = smov [#allocation2]   ;;  %s50_s24 = sshll.u32 %s2031_s4, 4  ;;  %s51_s24 = int_to_ptr.hbm [resolvable:$true] %s50_s24 }
   0xd   :  { %s39_s22 = sshll.u32 %s1490_s1, 4  ;;  %s1491_s25 = smov 128   ;;  %s40_s22 = int_to_ptr.vmem [resolvable:$true] %s39_s22 }
   0xe   :  { %s1492_s3 = smov 8   ;;  %s1493_s26 = smov [#allocation4]  }
   0xf   :  { %45 = dma.hbm_to_vmem [thread:$0]  %s38_s21, 256, %s40_s22, [#allocation3], %s1491_s25, %s1491_s25, %s1492_s3  }
  0x10   :  { %s52_s27 = sshll.u32 %s1493_s26, 4  ;;  %s53_s27 = int_to_ptr.vmem [resolvable:$true] %s52_s27 }
  0x11   :  { %58 = dma.hbm_to_vmem [thread:$0]  %s51_s24, 256, %s53_s27, [#allocation5], %s1491_s25, %s1491_s25, %s1492_s3  }
  0x12   :  { %1486 = dma.done.wait [#allocation3], 256  }
  0x13   :  { %1487 = vsyncadd [#allocation3], 4294967040 }
  0x14   :  { %1488 = dma.done.wait [#allocation5], 256  }
  0x15   :  { %1489 = vsyncadd [#allocation5], 4294967040  ;;  %v1603_v0 = vld [vmem:[%s2032_s5 + $0x18] sm:$0xff]  ;;  %v1608_v1 = vld [vmem:[%s2032_s5 + $0x10] sm:$0xff]  ;;  %s2054_s21 = sld [smem:[#allocation10_spill]]  ;;  %vm107_vm0 = vcmask 130048  }
  0x16   :  { %297 = vmatpush.msra.mxu3 %v1603_v0  ;;  %v1617_v3 = vld [vmem:[%s2032_s5 + $0x8] sm:$0xff]  ;;  %s2055_s3 = sld [smem:[#allocation8_spill]]  ;;  %v1629_v6 = vld [vmem:[%s2032_s5] sm:$0xff]  ;;  %vm281_vm1 = vcmask 261120   ;;  %v1640_v9 = vld [vmem:[%s2033_s6 + $0x18] sm:$0xff] }
  0x17   :  { %s2056_s0 = sld [smem:[#allocation9_spill]]  ;;  %v174_v8 = vld [vmem:[#allocation2 + $0x8] sm:$0xff]  ;;  %v173_v10 = vld [vmem:[#allocation2] sm:$0xff]  ;;  %v1646_v11 = vld [vmem:[%s2034_s7 + $0x18] sm:$0xff] }
  0x18   :  { %298 = vmatpush.msra.mxu3 %v1608_v1  ;;  %v1651_v12 = vld [vmem:[%s2033_s6 + $0x10] sm:$0xff]  ;;  %193 = vmatpush.msra.mxu1 %v174_v8  ;;  %v221_v13 = vld [vmem:[#allocation4 + $0x8] sm:$0xff]  ;;  %v1667_v16 = vld [vmem:[%s2033_s6 + $0x8] sm:$0xff] }
  0x19   :  { %240 = vmatpush.msra.mxu2 %v221_v13  ;;  %v220_v14 = vld [vmem:[#allocation4] sm:$0xff]  ;;  %v1674_v17 = vld [vmem:[%s2034_s7 + $0x8] sm:$0xff]  ;;  %v1680_v18 = vld [vmem:[%s2033_s6] sm:$0xff] }
  0x1a   :  { %299 = vmatpush.msra.mxu3 %v1617_v3  ;;  %194 = vmatpush.msra.mxu1 %v173_v10  ;;  %v1662_v15 = vld [vmem:[%s2034_s7 + $0x10] sm:$0xff]  ;;  %v1688_v19 = vld [vmem:[%s2034_s7] sm:$0xff] }
  0x1b   :  { %v102_v2 = vld [vmem:[%s2054_s21 + $0x8] sm:$0xff]  ;;  %v101_v4 = vld [vmem:[%s2054_s21] sm:$0xff]  ;;  %241 = vmatpush.msra.mxu2 %v220_v14 }
  0x1c   :  { %146 = vmatpush.msra.mxu0 %v102_v2  ;;  %v93_v5 = vld [vmem:[%s2055_s3] sm:$0xff]  ;;  %300 = vmatpush.msra.mxu3 %v1629_v6  ;;  %v94_v34 = vld [vmem:[%s2055_s3 + $0x8] sm:$0xff]  ;;  %v96_v14 = vld [vmem:[%s2055_s3 + $0x18] sm:$0xff] }
  0x1d   :  { %v1634_v7 = vld [vmem:[%s2056_s0] sm:$0xff]  ;;  %1284 = vmatmul.msk.f32.vlgmr.msra.gmra.mxu1 %vm107_vm0, %v93_v5  ;;  %1292 = vmatmul.msk.f32.vlgmr.msra.gmra.mxu2 %vm107_vm0, %v93_v5 }
  0x1e   :  { %147 = vmatpush.msra.mxu0 %v101_v4  ;;  %1300 = vmatmul.msk.f32.vlgmr.msra.gmra.mxu3 %vm281_vm1, %v1634_v7  ;;  %v1730_v20 = vld [vmem:[%s2035_s8] ss:$0 sm:$0xff] }
  0x1f   :  { %1276 = vmatmul.msk.f32.vlgmr.msra.gmra.mxu0 %vm107_vm0, %v93_v5  ;;  %337 = vmatpush.msrb.mxu3 %v1640_v9  ;;  %v1736_v25 = vld [vmem:[%s2036_s9] ss:$0 sm:$0xff] }
  0x20   :  { %600 = vmatpush.msrb.mxu0 %v1646_v11  ;;  %630 = vmatpush.msrb.mxu1 %v1603_v0  ;;  %v1748_v40 = vld [vmem:[%s2038_s11] ss:$0 sm:$0xff] }
  0x21   :  { %338 = vmatpush.msrb.mxu3 %v1651_v12  ;;  %670 = vmatpush.msrb.mxu2 %v1640_v9  ;;  %v1753_v45 = vld [vmem:[%s2037_s10] ss:$0 sm:$0xff] }
  0x22   :  { %601 = vmatpush.msrb.mxu0 %v1662_v15  ;;  %631 = vmatpush.msrb.mxu1 %v1608_v1 }
  0x23   :  { %339 = vmatpush.msrb.mxu3 %v1667_v16  ;;  %671 = vmatpush.msrb.mxu2 %v1651_v12 }
  0x24   :  { %602 = vmatpush.msrb.mxu0 %v1674_v17  ;;  %632 = vmatpush.msrb.mxu1 %v1617_v3 }
  0x25   :  { %340 = vmatpush.msrb.mxu3 %v1680_v18  ;;  %672 = vmatpush.msrb.mxu2 %v1667_v16 }
  0x26   :  { %603 = vmatpush.msrb.mxu0 %v1688_v19  ;;  %1302 = vmatmul.msk.f32.vlgmr.msrb.gmra.mxu3 %vm281_vm1, %v1634_v7 }
  0x27   :  { %380 = vmatpush.msra.mxu3 %v1646_v11  ;;  %633 = vmatpush.msrb.mxu1 %v1629_v6 }
  0x28   :  { %740 = vmatpush.msra.mxu0 %v1603_v0  ;;  %673 = vmatpush.msrb.mxu2 %v1680_v18 }
  0x29   :  { %381 = vmatpush.msra.mxu3 %v1662_v15  ;;  %780 = vmatpush.msra.mxu1 %v1640_v9 }
  0x2a   :  { %820 = vmatpush.msra.mxu2 %v1646_v11  ;;  %741 = vmatpush.msra.mxu0 %v1608_v1 }
  0x2b   :  { %382 = vmatpush.msra.mxu3 %v1674_v17  ;;  %781 = vmatpush.msra.mxu1 %v1651_v12 }
  0x2c   :  { %821 = vmatpush.msra.mxu2 %v1662_v15  ;;  %742 = vmatpush.msra.mxu0 %v1617_v3 }
  0x2d   :  { %383 = vmatpush.msra.mxu3 %v1688_v19  ;;  %782 = vmatpush.msra.mxu1 %v1667_v16 }
  0x2e   :  { %1304 = vmatmul.msk.f32.vlgmr.msra.gmra.mxu3 %vm281_vm1, %v1634_v7  ;;  %822 = vmatpush.msra.mxu2 %v1674_v17 }
  0x2f   :  { %410 = vmatpush.msrb.mxu3 %v1603_v0  ;;  %743 = vmatpush.msra.mxu0 %v1629_v6 }
  0x30   :  { %783 = vmatpush.msra.mxu1 %v1680_v18  ;;  %823 = vmatpush.msra.mxu2 %v1688_v19 }
  0x31   :  { %411 = vmatpush.msrb.mxu3 %v1608_v1  ;;  %1277 = vmatmul.msk.f32.gmra.mxu0 %vm107_vm0, %v94_v34 }
  0x32   :  { %1285 = vmatmul.msk.f32.gmra.mxu1 %vm107_vm0, %v94_v34  ;;  %1293 = vmatmul.msk.f32.gmra.mxu2 %vm107_vm0, %v94_v34 }
  0x33   :  { %412 = vmatpush.msrb.mxu3 %v1617_v3 }
  0x35   :  { %413 = vmatpush.msrb.mxu3 %v1629_v6 }
  0x37   :  { %450 = vmatpush.msra.mxu3 %v1640_v9 }
  0x39   :  { %451 = vmatpush.msra.mxu3 %v1651_v12 }
  0x3b   :  { %452 = vmatpush.msra.mxu3 %v1667_v16 }
  0x3d   :  { %453 = vmatpush.msra.mxu3 %v1680_v18 }
  0x9a   :  { %v196_v26 = vpop.f32.mrf.mxu1 }
  0x9b   :  { %v197_v28 = vadd.f32 %v1736_v25, %v196_v26  ;;  %v99_v26 = vld [vmem:[%s2055_s3 + $0x30] sm:$0xff] }
  0x9c   :  { %v149_v21 = vpop.f32.mrf.mxu0 }
  0x9d   :  { %v150_v22 = vadd.f32 %v1730_v20, %v149_v21  ;;  %v97_v21 = vld [vmem:[%s2055_s3 + $0x20] sm:$0xff] }
  0xa0   :  { %v243_v46 = vpop.f32.mrf.mxu2 }
  0xa1   :  { %v302_v23 = vpop.f32.mrf.mxu3  ;;  %v244_v53 = vadd.f32 %v1753_v45, %v243_v46 }
  0xa2   :  { %v305_v24 = vadd.f32 %v302_v23, %v150_v22  ;;  %v98_v22 = vld [vmem:[%s2055_s3 + $0x28] sm:$0xff] }
  0xa4   :  { %v1301_v27 = vmul.f32 -1.442695, %v305_v24 }
  0xa6   :  { %1354 = vpow2.f32 %v1301_v27 }
  0xa9   :  { %v342_v29 = vpop.f32.mrf.mxu3 }
  0xaa   :  { %v345_v30 = vadd.f32 %v342_v29, %v197_v28 }
  0xac   :  { %v1355_v31 = vpop.eup %1354  ;;  %v1303_v32 = vmul.f32 -1.442695, %v345_v30 }
  0xad   :  { %v309_v33 = vadd.f32 1.0, %v1355_v31 }
  0xae   :  { %1356 = vpow2.f32 %v1303_v32  ;;  %v152_v23 = vpop.f32.mrf.mxu0  ;;  %v100_v32 = vld [vmem:[%s2055_s3 + $0x38] sm:$0xff] }
  0xaf   :  { %1358 = vrcp.f32 %v309_v33  ;;  %v321_v41 = vand.u32 2147483648, %v309_v33  ;;  %v319_v44 = vand.u32 2147483647, %v309_v33  ;;  %vm315_vm3 = vweird.f32 %v309_v33  ;;  %v199_v29 = vpop.f32.mrf.mxu1 }
  0xb0   :  { %v153_v24 = vadd.f32 %v1730_v20, %v152_v23  ;;  %v200_v31 = vadd.f32 %v1736_v25, %v199_v29 }
  0xb1   :  { %v385_v42 = vpop.f32.mrf.mxu3  ;;  %v322_v50 = vor.u32 1.1754944e-38, %v321_v41  ;;  %vm320_vm5 = vcmp.eq.f32.partialorder %v319_v44, 8.507059e+37 }
  0xb2   :  { %v386_v48 = vadd.f32 %v1748_v40, %v385_v42 }
  0xb4   :  { %v1357_v35 = vpop.eup %1356 }
  0xb5   :  { %v1359_v36 = vpop.eup %1358  ;;  %v349_v37 = vadd.f32 1.0, %v1357_v35 }
  0xb6   :  { %v311_v38 = vmul.f32 %v1359_v36, %v309_v33  ;;  %vm316_vm2 = vweird.f32 %v1359_v36 }
  0xb7   :  { %1360 = vrcp.f32 %v349_v37  ;;  %vm317_vm4 = vmor %vm315_vm3, %vm316_vm2  ;;  %v361_v57 = vand.u32 2147483648, %v349_v37  ;;  %v359_v59 = vand.u32 2147483647, %v349_v37  ;;  %vm355_vm7 = vweird.f32 %v349_v37 }
  0xb8   :  { %v312_v39 = vsub.f32 1.0, %v311_v38 }
  0xb9   :  { %v362_v62 = vor.u32 1.1754944e-38, %v361_v57  ;;  %vm360_vm9 = vcmp.eq.f32.partialorder %v359_v59, 8.507059e+37 }
  0xba   :  { %v313_v43 = vmul.f32 %v1359_v36, %v312_v39 }
  0xbc   :  { %v314_v47 = vadd.f32 %v1359_v36, %v313_v43 }
  0xbd   :  { %v1361_v49 = vpop.eup %1360 }
  0xbe   :  { %v351_v51 = vmul.f32 %v1361_v49, %v349_v37  ;;  %v318_v52 = vsel %vm317_vm4, %v1359_v36, %v314_v47  ;;  %vm356_vm6 = vweird.f32 %v1361_v49 }
  0xbf   :  { %v323_v54 = vsel %vm320_vm5, %v322_v50, %v318_v52  ;;  %vm357_vm8 = vmor %vm355_vm7, %vm356_vm6 }
  0xc0   :  { %v352_v55 = vsub.f32 1.0, %v351_v51  ;;  %v388_v56 = vmul.f32 %v386_v48, %v323_v54  ;;  %v246_v48 = vpop.f32.mrf.mxu2 }
  0xc2   :  { %v353_v58 = vmul.f32 %v1361_v49, %v352_v55  ;;  %v389_v60 = vadd.f32 %v388_v56, %v244_v53  ;;  %v247_v53 = vadd.f32 %v1753_v45, %v246_v48 }
  0xc4   :  { %v354_v61 = vadd.f32 %v1361_v49, %v353_v58  ;;  %1362 = vtanh.f32 %v389_v60 }
  0xc6   :  { %v358_v63 = vsel %vm357_vm8, %v1361_v49, %v354_v61 }
  0xc7   :  { %v363_v2 = vsel %vm360_vm9, %v362_v62, %v358_v63 }
  0xc8   :  { %v391_v4 = vsub.f32 1.0, %v363_v2  ;;  %v393_v10 = vmul.f32 %v363_v2, %v1634_v7  ;;  %v95_v7 = vld [vmem:[%s2055_s3 + $0x10] sm:$0xff] }
  0xc9   :  { %1278 = vmatmul.msk.f32.gmra.mxu0 %vm107_vm0, %v95_v7  ;;  %1286 = vmatmul.msk.f32.gmra.mxu1 %vm107_vm0, %v95_v7 }
  0xca   :  { %v1363_v5 = vpop.eup %1362  ;;  %1294 = vmatmul.msk.f32.gmra.mxu2 %vm107_vm0, %v95_v7 }
  0xcb   :  { %v392_v8 = vmul.f32 %v1363_v5, %v391_v4 }
  0xcd   :  { %v1758_v13 = vadd.f32 %v393_v10, %v392_v8 }
  0xcf   :  { %1305 = vmatmul.msk.f32.vlgmr.msrb.gmra.mxu3 %vm281_vm1, %v1758_v13 }
  0xd0   :  { %490 = vmatpush.msrb.mxu3 %v1646_v11 }
  0xd1   :  { %1279 = vmatmul.msk.f32.gmra.mxu0 %vm107_vm0, %v96_v14  ;;  %1287 = vmatmul.msk.f32.gmra.mxu1 %vm107_vm0, %v96_v14 }
  0xd2   :  { %491 = vmatpush.msrb.mxu3 %v1662_v15  ;;  %1295 = vmatmul.msk.f32.gmra.mxu2 %vm107_vm0, %v96_v14 }
  0xd4   :  { %492 = vmatpush.msrb.mxu3 %v1674_v17 }
  0xd6   :  { %493 = vmatpush.msrb.mxu3 %v1688_v19 }
  0xd7   :  { %1307 = vmatmul.msk.f32.vlgmr.msra.gmra.mxu3 %vm281_vm1, %v1758_v13 }
  0xd8   :  { %520 = vmatpush.msra.mxu3 %v1603_v0 }
  0xd9   :  { %1280 = vmatmul.msk.f32.gmra.mxu0 %vm107_vm0, %v97_v21  ;;  %1288 = vmatmul.msk.f32.gmra.mxu1 %vm107_vm0, %v97_v21 }
  0xda   :  { %521 = vmatpush.msra.mxu3 %v1608_v1  ;;  %1296 = vmatmul.msk.f32.gmra.mxu2 %vm107_vm0, %v97_v21 }
  0xdc   :  { %522 = vmatpush.msra.mxu3 %v1617_v3 }
  0xde   :  { %523 = vmatpush.msra.mxu3 %v1629_v6 }
  0xdf   :  { %1309 = vmatmul.msk.f32.vlgmr.msrb.gmra.mxu3 %vm281_vm1, %v1758_v13 }
  0xe0   :  { %560 = vmatpush.msrb.mxu3 %v1640_v9 }
  0xe1   :  { %1281 = vmatmul.msk.f32.gmra.mxu0 %vm107_vm0, %v98_v22  ;;  %1289 = vmatmul.msk.f32.gmra.mxu1 %vm107_vm0, %v98_v22 }
  0xe2   :  { %561 = vmatpush.msrb.mxu3 %v1651_v12  ;;  %1297 = vmatmul.msk.f32.gmra.mxu2 %vm107_vm0, %v98_v22 }
  0xe4   :  { %562 = vmatpush.msrb.mxu3 %v1667_v16 }
  0xe6   :  { %563 = vmatpush.msrb.mxu3 %v1680_v18 }
  0xe9   :  { %1282 = vmatmul.msk.f32.gmra.mxu0 %vm107_vm0, %v99_v26  ;;  %1290 = vmatmul.msk.f32.gmra.mxu1 %vm107_vm0, %v99_v26 }
  0xea   :  { %1298 = vmatmul.msk.f32.gmra.mxu2 %vm107_vm0, %v99_v26 }
  0xf1   :  { %1283 = vmatmul.msk.f32.gmra.mxu0 %vm107_vm0, %v100_v32  ;;  %1291 = vmatmul.msk.f32.gmra.mxu1 %vm107_vm0, %v100_v32 }
  0xf2   :  { %1299 = vmatmul.msk.f32.gmra.mxu2 %vm107_vm0, %v100_v32 }
 0x152   :  { %v415_v27 = vpop.f32.mrf.mxu3 }
 0x153   :  { %v418_v28 = vadd.f32 %v415_v27, %v153_v24 }
 0x155   :  { %v1306_v30 = vmul.f32 -1.442695, %v418_v28 }
 0x157   :  { %1364 = vpow2.f32 %v1306_v30  ;;  %v202_v30 = vpop.f32.mrf.mxu1 }
 0x15a   :  { %v455_v33 = vpop.f32.mrf.mxu3 }
 0x15b   :  { %v458_v34 = vadd.f32 %v455_v33, %v200_v31  ;;  %v203_v33 = vadd.f32 %v1736_v25, %v202_v30 }
 0x15d   :  { %v1365_v35 = vpop.eup %1364  ;;  %v1308_v36 = vmul.f32 -1.442695, %v458_v34 }
 0x15e   :  { %v422_v37 = vadd.f32 1.0, %v1365_v35 }
 0x15f   :  { %1366 = vpow2.f32 %v1308_v36 }
 0x160   :  { %1368 = vrcp.f32 %v422_v37  ;;  %v434_v44 = vand.u32 2147483648, %v422_v37  ;;  %v432_v47 = vand.u32 2147483647, %v422_v37  ;;  %vm428_vm11 = vweird.f32 %v422_v37 }
 0x162   :  { %v495_v49 = vpop.f32.mrf.mxu3  ;;  %v435_v52 = vor.u32 1.1754944e-38, %v434_v44  ;;  %vm433_vm13 = vcmp.eq.f32.partialorder %v432_v47, 8.507059e+37 }
 0x163   :  { %v496_v56 = vadd.f32 %v1748_v40, %v495_v49 }
 0x165   :  { %v1367_v38 = vpop.eup %1366 }
 0x166   :  { %v1369_v39 = vpop.eup %1368  ;;  %v462_v41 = vadd.f32 1.0, %v1367_v38 }
 0x167   :  { %v424_v42 = vmul.f32 %v1369_v39, %v422_v37  ;;  %vm429_vm10 = vweird.f32 %v1369_v39 }
 0x168   :  { %1370 = vrcp.f32 %v462_v41  ;;  %vm430_vm12 = vmor %vm428_vm11, %vm429_vm10  ;;  %v474_v60 = vand.u32 2147483648, %v462_v41  ;;  %v472_v62 = vand.u32 2147483647, %v462_v41  ;;  %vm468_vm15 = vweird.f32 %v462_v41 }
 0x169   :  { %v425_v43 = vsub.f32 1.0, %v424_v42 }
 0x16a   :  { %v475_v4 = vor.u32 1.1754944e-38, %v474_v60  ;;  %vm473_vm2 = vcmp.eq.f32.partialorder %v472_v62, 8.507059e+37 }
 0x16b   :  { %v426_v46 = vmul.f32 %v1369_v39, %v425_v43 }
 0x16d   :  { %v427_v50 = vadd.f32 %v1369_v39, %v426_v46 }
 0x16e   :  { %v1371_v51 = vpop.eup %1370 }
 0x16f   :  { %v464_v54 = vmul.f32 %v1371_v51, %v462_v41  ;;  %v431_v55 = vsel %vm430_vm12, %v1369_v39, %v427_v50  ;;  %vm469_vm14 = vweird.f32 %v1371_v51 }
 0x170   :  { %v436_v57 = vsel %vm433_vm13, %v435_v52, %v431_v55  ;;  %vm470_vm0 = vmor %vm468_vm15, %vm469_vm14 }
 0x171   :  { %v465_v58 = vsub.f32 1.0, %v464_v54  ;;  %v498_v59 = vmul.f32 %v496_v56, %v436_v57 }
 0x173   :  { %v466_v61 = vmul.f32 %v1371_v51, %v465_v58  ;;  %v499_v63 = vadd.f32 %v498_v59, %v247_v53 }
 0x175   :  { %v467_v2 = vadd.f32 %v1371_v51, %v466_v61  ;;  %1372 = vtanh.f32 %v499_v63 }
 0x177   :  { %v471_v5 = vsel %vm470_vm0, %v1371_v51, %v467_v2  ;;  %v249_v51 = vpop.f32.mrf.mxu2 }
 0x178   :  { %v476_v8 = vsel %vm473_vm2, %v475_v4, %v471_v5  ;;  %v250_v57 = vadd.f32 %v1753_v45, %v249_v51 }
 0x179   :  { %v501_v10 = vsub.f32 1.0, %v476_v8  ;;  %v503_v21 = vmul.f32 %v476_v8, %v1758_v13  ;;  %v155_v13 = vpop.f32.mrf.mxu0 }
 0x17a   :  { %v156_v27 = vadd.f32 %v1730_v20, %v155_v13 }
 0x17b   :  { %v1373_v7 = vpop.eup %1372 }
 0x17c   :  { %v502_v14 = vmul.f32 %v1373_v7, %v501_v10 }
 0x17e   :  { %v1819_v22 = vadd.f32 %v503_v21, %v502_v14 }
 0x180   :  { %1310 = vmatmul.msk.f32.vlgmr.msra.gmra.mxu3 %vm281_vm1, %v1819_v22  ;;  %1314 = vmatmul.msk.f32.vlgmr.msrb.gmra.mxu0 %vm281_vm1, %v1819_v22 }
 0x181   :  { %710 = vmatpush.msra.mxu3 %v1646_v11  ;;  %890 = vmatpush.msrb.mxu0 %v1640_v9  ;;  %v1839_v23 = vpop.f32.mrf.mxu0 }
 0x183   :  { %711 = vmatpush.msra.mxu3 %v1662_v15  ;;  %891 = vmatpush.msrb.mxu0 %v1651_v12 }
 0x185   :  { %712 = vmatpush.msra.mxu3 %v1674_v17  ;;  %892 = vmatpush.msrb.mxu0 %v1667_v16 }
 0x187   :  { %713 = vmatpush.msra.mxu3 %v1688_v19  ;;  %893 = vmatpush.msrb.mxu0 %v1680_v18 }
 0x188   :  { %1312 = vmatmul.msk.f32.vlgmr.msrb.gmra.mxu3 %vm281_vm1, %v1819_v22 }
 0x189   :  { %850 = vmatpush.msrb.mxu3 %v1603_v0  ;;  %v1841_v24 = vpop.f32.mrf.mxu0 }
 0x18b   :  { %851 = vmatpush.msrb.mxu3 %v1608_v1 }
 0x18d   :  { %852 = vmatpush.msrb.mxu3 %v1617_v3 }
 0x18f   :  { %853 = vmatpush.msrb.mxu3 %v1629_v6 }
 0x191   :  { %v1843_v26 = vpop.f32.mrf.mxu0 }
 0x199   :  { %v1846_v32 = vpop.f32.mrf.mxu0 }
 0x1a1   :  { %v1849_v39 = vpop.f32.mrf.mxu0 }
 0x1fd   :  { %v605_v48 = vpop.f32.mrf.mxu0 }
 0x1fe   :  { %v606_v54 = vadd.f32 %v1748_v40, %v605_v48 }
 0x203   :  { %v525_v28 = vpop.f32.mrf.mxu3 }
 0x204   :  { %v528_v29 = vadd.f32 %v525_v28, %v156_v27 }
 0x206   :  { %v1311_v31 = vmul.f32 -1.442695, %v528_v29  ;;  %v252_v29 = vpop.f32.mrf.mxu2 }
 0x208   :  { %1374 = vpow2.f32 %v1311_v31 }
 0x20b   :  { %v565_v34 = vpop.f32.mrf.mxu3 }
 0x20c   :  { %v568_v35 = vadd.f32 %v565_v34, %v203_v33 }
 0x20e   :  { %v1375_v36 = vpop.eup %1374  ;;  %v1313_v37 = vmul.f32 -1.442695, %v568_v35  ;;  %v1876_v31 = vpop.f32.mrf.mxu2 }
 0x20f   :  { %v532_v38 = vadd.f32 1.0, %v1375_v36 }
 0x210   :  { %1376 = vpow2.f32 %v1313_v37 }
 0x211   :  { %1378 = vrcp.f32 %v532_v38  ;;  %v544_v47 = vand.u32 2147483648, %v532_v38  ;;  %v542_v50 = vand.u32 2147483647, %v532_v38  ;;  %vm538_vm4 = vweird.f32 %v532_v38 }
 0x213   :  { %v545_v55 = vor.u32 1.1754944e-38, %v544_v47  ;;  %vm543_vm6 = vcmp.eq.f32.partialorder %v542_v50, 8.507059e+37 }
 0x216   :  { %v1377_v41 = vpop.eup %1376  ;;  %v1880_v34 = vpop.f32.mrf.mxu2 }
 0x217   :  { %v1379_v42 = vpop.eup %1378  ;;  %v572_v43 = vadd.f32 1.0, %v1377_v41  ;;  %v159_v41 = vadd.f32 %v1730_v20, %v1839_v23 }
 0x218   :  { %v534_v44 = vmul.f32 %v1379_v42, %v532_v38  ;;  %vm539_vm3 = vweird.f32 %v1379_v42 }
 0x219   :  { %1380 = vrcp.f32 %v572_v43  ;;  %vm540_vm5 = vmor %vm538_vm4, %vm539_vm3  ;;  %v584_v62 = vand.u32 2147483648, %v572_v43  ;;  %v582_v4 = vand.u32 2147483647, %v572_v43  ;;  %vm578_vm8 = vweird.f32 %v572_v43 }
 0x21a   :  { %v535_v46 = vsub.f32 1.0, %v534_v44 }
 0x21b   :  { %v585_v8 = vor.u32 1.1754944e-38, %v584_v62  ;;  %vm583_vm10 = vcmp.eq.f32.partialorder %v582_v4, 8.507059e+37 }
 0x21c   :  { %v536_v49 = vmul.f32 %v1379_v42, %v535_v46 }
 0x21e   :  { %v537_v52 = vadd.f32 %v1379_v42, %v536_v49  ;;  %v1884_v36 = vpop.f32.mrf.mxu2 }
 0x21f   :  { %v1381_v53 = vpop.eup %1380 }
 0x220   :  { %v574_v56 = vmul.f32 %v1381_v53, %v572_v43  ;;  %v541_v58 = vsel %vm540_vm5, %v1379_v42, %v537_v52  ;;  %vm579_vm7 = vweird.f32 %v1381_v53 }
 0x221   :  { %v546_v59 = vsel %vm543_vm6, %v545_v55, %v541_v58  ;;  %vm580_vm9 = vmor %vm578_vm8, %vm579_vm7 }
 0x222   :  { %v575_v60 = vsub.f32 1.0, %v574_v56  ;;  %v608_v61 = vmul.f32 %v606_v54, %v546_v59 }
 0x224   :  { %v576_v63 = vmul.f32 %v1381_v53, %v575_v60  ;;  %v609_v2 = vadd.f32 %v608_v61, %v250_v57 }
 0x226   :  { %1382 = vtanh.f32 %v609_v2  ;;  %v577_v5 = vadd.f32 %v1381_v53, %v576_v63  ;;  %v1888_v38 = vpop.f32.mrf.mxu2 }
 0x228   :  { %v581_v10 = vsel %vm580_vm9, %v1381_v53, %v577_v5 }
 0x229   :  { %v586_v7 = vsel %vm583_vm10, %v585_v8, %v581_v10  ;;  %v253_v8 = vadd.f32 %v1753_v45, %v252_v29 }
 0x22a   :  { %v611_v14 = vsub.f32 1.0, %v586_v7  ;;  %v613_v27 = vmul.f32 %v586_v7, %v1819_v22  ;;  %v205_v22 = vpop.f32.mrf.mxu1 }
 0x22b   :  { %v206_v46 = vadd.f32 %v1736_v25, %v205_v22 }
 0x22c   :  { %v1383_v21 = vpop.eup %1382 }
 0x22d   :  { %v612_v13 = vmul.f32 %v1383_v21, %v611_v14 }
 0x22f   :  { %v1854_v28 = vadd.f32 %v613_v27, %v612_v13 }
 0x231   :  { %1315 = vmatmul.msk.f32.vlgmr.msrb.gmra.mxu1 %vm281_vm1, %v1854_v28  ;;  %1317 = vmatmul.msk.f32.vlgmr.msrb.gmra.mxu2 %vm281_vm1, %v1854_v28 }
 0x232   :  { %1319 = vmatmul.msk.f32.vlgmr.msra.gmra.mxu3 %vm281_vm1, %v1854_v28  ;;  %930 = vmatpush.msrb.mxu1 %v1646_v11  ;;  %v1874_v30 = vpop.f32.mrf.mxu1 }
 0x233   :  { %960 = vmatpush.msrb.mxu2 %v1603_v0  ;;  %1000 = vmatpush.msra.mxu3 %v1640_v9 }
 0x234   :  { %931 = vmatpush.msrb.mxu1 %v1662_v15 }
 0x235   :  { %961 = vmatpush.msrb.mxu2 %v1608_v1  ;;  %1001 = vmatpush.msra.mxu3 %v1651_v12 }
 0x236   :  { %932 = vmatpush.msrb.mxu1 %v1674_v17 }
 0x237   :  { %962 = vmatpush.msrb.mxu2 %v1617_v3  ;;  %1002 = vmatpush.msra.mxu3 %v1667_v16 }
 0x238   :  { %933 = vmatpush.msrb.mxu1 %v1688_v19 }
 0x239   :  { %963 = vmatpush.msrb.mxu2 %v1629_v6  ;;  %1003 = vmatpush.msra.mxu3 %v1680_v18 }
 0x23a   :  { %v1878_v33 = vpop.f32.mrf.mxu1 }
 0x242   :  { %v1882_v35 = vpop.f32.mrf.mxu1 }
 0x24a   :  { %v1886_v37 = vpop.f32.mrf.mxu1 }
 0x2ae   :  { %v635_v42 = vpop.f32.mrf.mxu1 }
 0x2af   :  { %v638_v43 = vadd.f32 %v635_v42, %v159_v41 }
 0x2b1   :  { %v1316_v44 = vmul.f32 -1.442695, %v638_v43 }
 0x2b3   :  { %1384 = vpow2.f32 %v1316_v44 }
 0x2b4   :  { %v675_v47 = vpop.f32.mrf.mxu2 }
 0x2b5   :  { %v678_v48 = vadd.f32 %v675_v47, %v206_v46  ;;  %v715_v60 = vpop.f32.mrf.mxu3 }
 0x2b6   :  { %v716_v5 = vadd.f32 %v1748_v40, %v715_v60 }
 0x2b7   :  { %v1318_v49 = vmul.f32 -1.442695, %v678_v48 }
 0x2b9   :  { %v1385_v50 = vpop.eup %1384  ;;  %1386 = vpow2.f32 %v1318_v49 }
 0x2ba   :  { %v642_v51 = vadd.f32 1.0, %v1385_v50 }
 0x2bc   :  { %1388 = vrcp.f32 %v642_v51  ;;  %v654_v23 = vand.u32 2147483648, %v642_v51  ;;  %v652_v58 = vand.u32 2147483647, %v642_v51  ;;  %vm648_vm12 = vweird.f32 %v642_v51 }
 0x2be   :  { %v655_v63 = vor.u32 1.1754944e-38, %v654_v23  ;;  %vm653_vm14 = vcmp.eq.f32.partialorder %v652_v58, 8.507059e+37 }
 0x2bf   :  { %v1387_v52 = vpop.eup %1386 }
 0x2c0   :  { %v682_v53 = vadd.f32 1.0, %v1387_v52 }
 0x2c2   :  { %v1389_v54 = vpop.eup %1388  ;;  %1390 = vrcp.f32 %v682_v53  ;;  %v694_v14 = vand.u32 2147483648, %v682_v53  ;;  %v692_v13 = vand.u32 2147483647, %v682_v53  ;;  %vm688_vm0 = vweird.f32 %v682_v53 }
 0x2c3   :  { %v644_v55 = vmul.f32 %v1389_v54, %v642_v51  ;;  %vm649_vm11 = vweird.f32 %v1389_v54 }
 0x2c4   :  { %vm650_vm13 = vmor %vm648_vm12, %vm649_vm11  ;;  %v695_v41 = vor.u32 1.1754944e-38, %v694_v14  ;;  %vm693_vm3 = vcmp.eq.f32.partialorder %v692_v13, 8.507059e+37 }
 0x2c5   :  { %v645_v56 = vsub.f32 1.0, %v644_v55 }
 0x2c7   :  { %v646_v57 = vmul.f32 %v1389_v54, %v645_v56 }
 0x2c8   :  { %v1391_v59 = vpop.eup %1390 }
 0x2c9   :  { %v684_v61 = vmul.f32 %v1391_v59, %v682_v53  ;;  %v647_v62 = vadd.f32 %v1389_v54, %v646_v57  ;;  %vm689_vm15 = vweird.f32 %v1391_v59 }
 0x2ca   :  { %vm690_vm2 = vmor %vm688_vm0, %vm689_vm15 }
 0x2cb   :  { %v685_v2 = vsub.f32 1.0, %v684_v61  ;;  %v651_v4 = vsel %vm650_vm13, %v1389_v54, %v647_v62 }
 0x2cc   :  { %v656_v10 = vsel %vm653_vm14, %v655_v63, %v651_v4 }
 0x2cd   :  { %v686_v7 = vmul.f32 %v1391_v59, %v685_v2  ;;  %v718_v21 = vmul.f32 %v716_v5, %v656_v10  ;;  %v256_v5 = vadd.f32 %v1753_v45, %v1876_v31  ;;  %v212_v31 = vadd.f32 %v1736_v25, %v1878_v33 }
 0x2cf   :  { %v687_v27 = vadd.f32 %v1391_v59, %v686_v7  ;;  %v719_v22 = vadd.f32 %v718_v21, %v253_v8 }
 0x2d1   :  { %v691_v42 = vsel %vm690_vm2, %v1391_v59, %v687_v27  ;;  %1392 = vtanh.f32 %v719_v22 }
 0x2d2   :  { %v696_v43 = vsel %vm693_vm3, %v695_v41, %v691_v42 }
 0x2d3   :  { %v721_v44 = vsub.f32 1.0, %v696_v43  ;;  %v723_v29 = vmul.f32 %v696_v43, %v1854_v28 }
 0x2d7   :  { %v1393_v46 = vpop.eup %1392 }
 0x2d8   :  { %v722_v47 = vmul.f32 %v1393_v46, %v721_v44 }
 0x2da   :  { %v1896_v48 = vadd.f32 %v723_v29, %v722_v47 }
 0x2dc   :  { %1320 = vmatmul.msk.f32.vlgmr.msra.gmra.mxu0 %vm281_vm1, %v1896_v48  ;;  %1322 = vmatmul.msk.f32.vlgmr.msra.gmra.mxu1 %vm281_vm1, %v1896_v48 }
 0x2dd   :  { %1324 = vmatmul.msk.f32.vlgmr.msra.gmra.mxu2 %vm281_vm1, %v1896_v48  ;;  %1040 = vmatpush.msra.mxu0 %v1646_v11 }
 0x2de   :  { %1070 = vmatpush.msra.mxu1 %v1603_v0  ;;  %1110 = vmatpush.msra.mxu2 %v1640_v9  ;;  %v162_v0 = vadd.f32 %v1730_v20, %v1841_v24 }
 0x2df   :  { %1041 = vmatpush.msra.mxu0 %v1662_v15 }
 0x2e0   :  { %1071 = vmatpush.msra.mxu1 %v1608_v1  ;;  %1111 = vmatpush.msra.mxu2 %v1651_v12  ;;  %v209_v1 = vadd.f32 %v1736_v25, %v1874_v30 }
 0x2e1   :  { %1042 = vmatpush.msra.mxu0 %v1674_v17 }
 0x2e2   :  { %1072 = vmatpush.msra.mxu1 %v1617_v3  ;;  %1112 = vmatpush.msra.mxu2 %v1667_v16 }
 0x2e3   :  { %1043 = vmatpush.msra.mxu0 %v1688_v19 }
 0x2e4   :  { %1073 = vmatpush.msra.mxu1 %v1629_v6  ;;  %1113 = vmatpush.msra.mxu2 %v1680_v18 }
 0x359   :  { %v745_v9 = vpop.f32.mrf.mxu0  ;;  %v785_v12 = vpop.f32.mrf.mxu1 }
 0x35a   :  { %v748_v28 = vadd.f32 %v745_v9, %v162_v0  ;;  %v788_v49 = vadd.f32 %v785_v12, %v209_v1 }
 0x35c   :  { %v1321_v50 = vmul.f32 -1.442695, %v748_v28  ;;  %v1323_v3 = vmul.f32 -1.442695, %v788_v49 }
 0x35e   :  { %1394 = vpow2.f32 %v1321_v50 }
 0x35f   :  { %1396 = vpow2.f32 %v1323_v3 }
 0x360   :  { %v825_v59 = vpop.f32.mrf.mxu2 }
 0x361   :  { %v826_v63 = vadd.f32 %v1748_v40, %v825_v59 }
 0x364   :  { %v1395_v16 = vpop.eup %1394 }
 0x365   :  { %v1397_v51 = vpop.eup %1396  ;;  %v752_v52 = vadd.f32 1.0, %v1395_v16 }
 0x366   :  { %v792_v6 = vadd.f32 1.0, %v1397_v51 }
 0x367   :  { %1398 = vrcp.f32 %v752_v52  ;;  %v764_v56 = vand.u32 2147483648, %v752_v52  ;;  %v762_v57 = vand.u32 2147483647, %v752_v52  ;;  %vm758_vm5 = vweird.f32 %v752_v52 }
 0x368   :  { %1400 = vrcp.f32 %v792_v6  ;;  %v804_v8 = vand.u32 2147483648, %v792_v6  ;;  %vm798_vm9 = vweird.f32 %v792_v6  ;;  %v802_v7 = vand.u32 2147483647, %v792_v6 }
 0x369   :  { %v765_v61 = vor.u32 1.1754944e-38, %v764_v56  ;;  %vm763_vm7 = vcmp.eq.f32.partialorder %v762_v57, 8.507059e+37  ;;  %v259_v56 = vadd.f32 %v1753_v45, %v1880_v34  ;;  %v168_v34 = vadd.f32 %v1730_v20, %v1846_v32 }
 0x36a   :  { %v805_v13 = vor.u32 1.1754944e-38, %v804_v8  ;;  %vm803_vm11 = vcmp.eq.f32.partialorder %v802_v7, 8.507059e+37 }
 0x36d   :  { %v1399_v18 = vpop.eup %1398 }
 0x36e   :  { %v1401_v53 = vpop.eup %1400  ;;  %v754_v24 = vmul.f32 %v1399_v18, %v752_v52  ;;  %vm759_vm4 = vweird.f32 %v1399_v18 }
 0x36f   :  { %v794_v54 = vmul.f32 %v1401_v53, %v792_v6  ;;  %vm760_vm6 = vmor %vm758_vm5, %vm759_vm4  ;;  %vm799_vm8 = vweird.f32 %v1401_v53 }
 0x370   :  { %v755_v55 = vsub.f32 1.0, %v754_v24  ;;  %vm800_vm10 = vmor %vm798_vm9, %vm799_vm8 }
 0x371   :  { %v795_v30 = vsub.f32 1.0, %v794_v54 }
 0x372   :  { %v756_v23 = vmul.f32 %v1399_v18, %v755_v55 }
 0x373   :  { %v796_v58 = vmul.f32 %v1401_v53, %v795_v30 }
 0x374   :  { %v757_v60 = vadd.f32 %v1399_v18, %v756_v23 }
 0x375   :  { %v797_v2 = vadd.f32 %v1401_v53, %v796_v58 }
 0x376   :  { %v761_v62 = vsel %vm760_vm6, %v1399_v18, %v757_v60 }
 0x377   :  { %v766_v4 = vsel %vm763_vm7, %v765_v61, %v761_v62  ;;  %v801_v21 = vsel %vm800_vm10, %v1401_v53, %v797_v2 }
 0x378   :  { %v828_v10 = vmul.f32 %v826_v63, %v766_v4  ;;  %v806_v27 = vsel %vm803_vm11, %v805_v13, %v801_v21 }
 0x379   :  { %v831_v22 = vsub.f32 1.0, %v806_v27  ;;  %v833_v43 = vmul.f32 %v806_v27, %v1896_v48  ;;  %v165_v48 = vadd.f32 %v1730_v20, %v1843_v26 }
 0x37a   :  { %v829_v14 = vadd.f32 %v828_v10, %v256_v5  ;;  %v215_v10 = vadd.f32 %v1736_v25, %v1882_v35 }
 0x37c   :  { %1402 = vtanh.f32 %v829_v14 }
 0x382   :  { %v1403_v41 = vpop.eup %1402 }
 0x383   :  { %v832_v42 = vmul.f32 %v1403_v41, %v831_v22 }
 0x385   :  { %v834_v44 = vadd.f32 %v833_v43, %v832_v42 }
 0x387   :  { %1325 = vmatmul.msk.f32.vlgmr.msrb.gmra.mxu3 %vm281_vm1, %v834_v44  ;;  %1327 = vmatmul.msk.f32.vlgmr.msrb.gmra.mxu0 %vm281_vm1, %v834_v44 }
 0x388   :  { %1329 = vmatmul.msk.f32.vlgmr.msrb.gmra.mxu1 %vm281_vm1, %v834_v44  ;;  %1150 = vmatpush.msrb.mxu3 %v1646_v11 }
 0x38a   :  { %1151 = vmatpush.msrb.mxu3 %v1662_v15 }
 0x38c   :  { %1152 = vmatpush.msrb.mxu3 %v1674_v17 }
 0x38e   :  { %1153 = vmatpush.msrb.mxu3 %v1688_v19 }
 0x404   :  { %v895_v46 = vpop.f32.mrf.mxu0 }
 0x405   :  { %v898_v47 = vadd.f32 %v895_v46, %v212_v31  ;;  %v935_v6 = vpop.f32.mrf.mxu1 }
 0x406   :  { %v936_v24 = vadd.f32 %v1748_v40, %v935_v6 }
 0x407   :  { %v1328_v29 = vmul.f32 -1.442695, %v898_v47 }
 0x409   :  { %1404 = vpow2.f32 %v1328_v29 }
 0x40a   :  { %v855_v0 = vpop.f32.mrf.mxu3 }
 0x40b   :  { %v858_v1 = vadd.f32 %v855_v0, %v165_v48 }
 0x40d   :  { %v1326_v9 = vmul.f32 -1.442695, %v858_v1 }
 0x40f   :  { %v1405_v11 = vpop.eup %1404  ;;  %1406 = vpow2.f32 %v1326_v9 }
 0x410   :  { %v902_v15 = vadd.f32 1.0, %v1405_v11 }
 0x412   :  { %1408 = vrcp.f32 %v902_v15  ;;  %v914_v23 = vand.u32 2147483648, %v902_v15  ;;  %vm908_vm2 = vweird.f32 %v902_v15  ;;  %v912_v58 = vand.u32 2147483647, %v902_v15 }
 0x414   :  { %v915_v61 = vor.u32 1.1754944e-38, %v914_v23  ;;  %vm913_vm4 = vcmp.eq.f32.partialorder %v912_v58, 8.507059e+37  ;;  %v1169_v58 = vld [vmem:[%s2039_s12 + $0x18] sm:$0xff] }
 0x415   :  { %v1407_v17 = vpop.eup %1406  ;;  %1189 = vmatpush.msrb.mxu0 %v1169_v58 }
 0x416   :  { %v862_v12 = vadd.f32 1.0, %v1407_v17 }
 0x418   :  { %1410 = vrcp.f32 %v862_v12  ;;  %v1409_v19 = vpop.eup %1408  ;;  %v874_v16 = vand.u32 2147483648, %v862_v12  ;;  %v872_v26 = vand.u32 2147483647, %v862_v12  ;;  %vm868_vm13 = vweird.f32 %v862_v12 }
 0x419   :  { %v904_v28 = vmul.f32 %v1409_v19, %v902_v15  ;;  %vm909_vm0 = vweird.f32 %v1409_v19 }
 0x41a   :  { %v875_v53 = vor.u32 1.1754944e-38, %v874_v16  ;;  %vm873_vm15 = vcmp.eq.f32.partialorder %v872_v26, 8.507059e+37  ;;  %vm910_vm3 = vmor %vm908_vm2, %vm909_vm0 }
 0x41b   :  { %v905_v50 = vsub.f32 1.0, %v904_v28  ;;  %v262_v28 = vadd.f32 %v1753_v45, %v1884_v36  ;;  %v1434_v45 = vld [vmem:[%s2035_s8] ss:$0 sm:$0xff] }
 0x41c   :  { %v171_v36 = vadd.f32 %v1434_v45, %v1849_v39  ;;  %v1168_v39 = vld [vmem:[%s2039_s12 + $0x10] sm:$0xff] }
 0x41d   :  { %v906_v52 = vmul.f32 %v1409_v19, %v905_v50  ;;  %1190 = vmatpush.msrb.mxu0 %v1168_v39 }
 0x41e   :  { %v1411_v33 = vpop.eup %1410 }
 0x41f   :  { %v864_v49 = vmul.f32 %v1411_v33, %v862_v12  ;;  %vm869_vm12 = vweird.f32 %v1411_v33  ;;  %v907_v55 = vadd.f32 %v1409_v19, %v906_v52 }
 0x420   :  { %vm870_vm14 = vmor %vm868_vm13, %vm869_vm12 }
 0x421   :  { %v865_v3 = vsub.f32 1.0, %v864_v49  ;;  %v911_v60 = vsel %vm910_vm3, %v1409_v19, %v907_v55 }
 0x422   :  { %v916_v62 = vsel %vm913_vm4, %v915_v61, %v911_v60  ;;  %v1167_v60 = vld [vmem:[%s2039_s12 + $0x8] sm:$0xff] }
 0x423   :  { %v866_v51 = vmul.f32 %v1411_v33, %v865_v3  ;;  %v941_v63 = vsub.f32 1.0, %v916_v62  ;;  %v943_v5 = vmul.f32 %v916_v62, %v834_v44  ;;  %1191 = vmatpush.msrb.mxu0 %v1167_v60 }
 0x425   :  { %v867_v18 = vadd.f32 %v1411_v33, %v866_v51 }
 0x427   :  { %v871_v54 = vsel %vm870_vm14, %v1411_v33, %v867_v18 }
 0x428   :  { %v876_v30 = vsel %vm873_vm15, %v875_v53, %v871_v54 }
 0x429   :  { %v938_v57 = vmul.f32 %v936_v24, %v876_v30  ;;  %v1435_v30 = vld [vmem:[%s2036_s9] ss:$0 sm:$0xff] }
 0x42b   :  { %v939_v59 = vadd.f32 %v938_v57, %v259_v56  ;;  %v218_v56 = vadd.f32 %v1435_v30, %v1886_v37  ;;  %v1166_v37 = vld [vmem:[%s2039_s12] sm:$0xff] }
 0x42c   :  { %1192 = vmatpush.msrb.mxu0 %v1166_v37 }
 0x42d   :  { %1412 = vtanh.f32 %v939_v59 }
 0x433   :  { %v1413_v2 = vpop.eup %1412 }
 0x434   :  { %v942_v4 = vmul.f32 %v1413_v2, %v941_v63  ;;  %v1203_v63 = vld [vmem:[%s2041_s14 + $0x18] sm:$0xff] }
 0x435   :  { %1223 = vmatpush.msrb.mxu1 %v1203_v63 }
 0x436   :  { %v944_v8 = vadd.f32 %v943_v5, %v942_v4 }
 0x438   :  { %1330 = vmatmul.msk.f32.vlgmr.msrb.gmra.mxu2 %vm281_vm1, %v944_v8  ;;  %1332 = vmatmul.msk.f32.vlgmr.msra.gmra.mxu3 %vm281_vm1, %v944_v8 }
 0x439   :  { %1334 = vmatmul.msk.f32.vlgmr.msra.gmra.mxu0 %vm281_vm1, %v944_v8 }
 0x4b6   :  { %v1045_v0 = vpop.f32.mrf.mxu0 }
 0x4b7   :  { %v1046_v15 = vadd.f32 %v1748_v40, %v1045_v0 }
 0x4bb   :  { %v965_v7 = vpop.f32.mrf.mxu2  ;;  %v1005_v14 = vpop.f32.mrf.mxu3 }
 0x4bc   :  { %v968_v21 = vadd.f32 %v965_v7, %v168_v34  ;;  %v1008_v13 = vadd.f32 %v1005_v14, %v215_v10 }
 0x4be   :  { %v1331_v27 = vmul.f32 -1.442695, %v968_v21  ;;  %v1333_v22 = vmul.f32 -1.442695, %v1008_v13 }
 0x4c0   :  { %1414 = vpow2.f32 %v1331_v27 }
 0x4c1   :  { %1416 = vpow2.f32 %v1333_v22 }
 0x4c6   :  { %v1415_v41 = vpop.eup %1414 }
 0x4c7   :  { %v1417_v42 = vpop.eup %1416  ;;  %v972_v43 = vadd.f32 1.0, %v1415_v41 }
 0x4c8   :  { %v1012_v44 = vadd.f32 1.0, %v1417_v42 }
 0x4c9   :  { %1418 = vrcp.f32 %v972_v43  ;;  %v984_v25 = vand.u32 2147483648, %v972_v43  ;;  %v982_v48 = vand.u32 2147483647, %v972_v43  ;;  %vm978_vm6 = vweird.f32 %v972_v43 }
 0x4ca   :  { %1420 = vrcp.f32 %v1012_v44  ;;  %v1024_v49 = vand.u32 2147483648, %v1012_v44  ;;  %vm1018_vm10 = vweird.f32 %v1012_v44  ;;  %v1022_v50 = vand.u32 2147483647, %v1012_v44 }
 0x4cb   :  { %v985_v11 = vor.u32 1.1754944e-38, %v984_v25  ;;  %vm983_vm8 = vcmp.eq.f32.partialorder %v982_v48, 8.507059e+37 }
 0x4cc   :  { %v1025_v51 = vor.u32 1.1754944e-38, %v1024_v49  ;;  %vm1023_vm12 = vcmp.eq.f32.partialorder %v1022_v50, 8.507059e+37  ;;  %v1200_v49 = vld [vmem:[%s2041_s14] sm:$0xff]  ;;  %v1237_v50 = vld [vmem:[%s2043_s16 + $0x18] sm:$0xff] }
 0x4cd   :  { %1257 = vmatpush.msrb.mxu2 %v1237_v50 }
 0x4cf   :  { %v1419_v31 = vpop.eup %1418 }
 0x4d0   :  { %v1421_v46 = vpop.eup %1420  ;;  %v974_v20 = vmul.f32 %v1419_v31, %v972_v43  ;;  %vm979_vm5 = vweird.f32 %v1419_v31 }
 0x4d1   :  { %v1014_v32 = vmul.f32 %v1421_v46, %v1012_v44  ;;  %vm980_vm7 = vmor %vm978_vm6, %vm979_vm5  ;;  %vm1019_vm9 = vweird.f32 %v1421_v46  ;;  %v1436_v44 = vld [vmem:[%s2038_s11] ss:$0 sm:$0xff] }
 0x4d2   :  { %v975_v47 = vsub.f32 1.0, %v974_v20  ;;  %vm1020_vm11 = vmor %vm1018_vm10, %vm1019_vm9 }
 0x4d3   :  { %v1015_v35 = vsub.f32 1.0, %v1014_v32 }
 0x4d4   :  { %v976_v29 = vmul.f32 %v1419_v31, %v975_v47 }
 0x4d5   :  { %v1016_v1 = vmul.f32 %v1421_v46, %v1015_v35 }
 0x4d6   :  { %v977_v9 = vadd.f32 %v1419_v31, %v976_v29 }
 0x4d7   :  { %v1017_v19 = vadd.f32 %v1421_v46, %v1016_v1 }
 0x4d8   :  { %v981_v17 = vsel %vm980_vm7, %v1419_v31, %v977_v9 }
 0x4d9   :  { %v986_v12 = vsel %vm983_vm8, %v985_v11, %v981_v17  ;;  %v1021_v16 = vsel %vm1020_vm11, %v1421_v46, %v1017_v19  ;;  %v1437_v46 = vld [vmem:[%s2037_s10] ss:$0 sm:$0xff] }
 0x4da   :  { %v1048_v33 = vmul.f32 %v1046_v15, %v986_v12  ;;  %v1026_v26 = vsel %vm1023_vm12, %v1025_v51, %v1021_v16  ;;  %v265_v20 = vadd.f32 %v1437_v46, %v1888_v38 }
 0x4db   :  { %v1051_v40 = vsub.f32 1.0, %v1026_v26  ;;  %v1053_v18 = vmul.f32 %v1026_v26, %v944_v8 }
 0x4dc   :  { %v1049_v3 = vadd.f32 %v1048_v33, %v262_v28  ;;  %v1202_v28 = vld [vmem:[%s2041_s14 + $0x10] sm:$0xff]  ;;  %v1201_v33 = vld [vmem:[%s2041_s14 + $0x8] sm:$0xff] }
 0x4dd   :  { %1224 = vmatpush.msrb.mxu1 %v1202_v28 }
 0x4de   :  { %1422 = vtanh.f32 %v1049_v3  ;;  %v1351_v3 = vld [vmem:[%s2040_s13] ss:$0 sm:$0xff] }
 0x4df   :  { %1225 = vmatpush.msrb.mxu1 %v1201_v33 }
 0x4e1   :  { %1226 = vmatpush.msrb.mxu1 %v1200_v49 }
 0x4e4   :  { %v1423_v52 = vpop.eup %1422 }
 0x4e5   :  { %v1052_v6 = vmul.f32 %v1423_v52, %v1051_v40  ;;  %v1236_v52 = vld [vmem:[%s2043_s16 + $0x10] sm:$0xff] }
 0x4e6   :  { %1258 = vmatpush.msrb.mxu2 %v1236_v52 }
 0x4e7   :  { %v1948_v53 = vadd.f32 %v1053_v18, %v1052_v6  ;;  %v1235_v6 = vld [vmem:[%s2043_s16 + $0x8] sm:$0xff]  ;;  %v1234_v18 = vld [vmem:[%s2043_s16] sm:$0xff] }
 0x4e8   :  { %1259 = vmatpush.msrb.mxu2 %v1235_v6 }
 0x4e9   :  { %1335 = vmatmul.msk.f32.vlgmr.msra.gmra.mxu1 %vm281_vm1, %v1948_v53  ;;  %1337 = vmatmul.msk.f32.vlgmr.msra.gmra.mxu2 %vm281_vm1, %v1948_v53 }
 0x4ea   :  { %1339 = vmatmul.msk.f32.vlgmr.msrb.gmra.mxu3 %vm281_vm1, %v1948_v53  ;;  %1260 = vmatpush.msrb.mxu2 %v1234_v18 }
 0x566   :  { %v1075_v24 = vpop.f32.mrf.mxu1 }
 0x567   :  { %v1078_v54 = vadd.f32 %v1075_v24, %v171_v36 }
 0x569   :  { %v1336_v55 = vmul.f32 -1.442695, %v1078_v54 }
 0x56b   :  { %1424 = vpow2.f32 %v1336_v55  ;;  %v1353_v55 = vld [vmem:[%s2044_s17] ss:$0 sm:$0xff] }
 0x56c   :  { %v1115_v23 = vpop.f32.mrf.mxu2 }
 0x56d   :  { %v1118_v57 = vadd.f32 %v1115_v23, %v218_v56  ;;  %v1155_v13 = vpop.f32.mrf.mxu3 }
 0x56e   :  { %v1156_v31 = vadd.f32 %v1436_v44, %v1155_v13 }
 0x56f   :  { %v1338_v59 = vmul.f32 -1.442695, %v1118_v57 }
 0x571   :  { %v1425_v61 = vpop.eup %1424  ;;  %1426 = vpow2.f32 %v1338_v59 }
 0x572   :  { %v1082_v62 = vadd.f32 1.0, %v1425_v61 }
 0x574   :  { %1428 = vrcp.f32 %v1082_v62  ;;  %v1094_v10 = vand.u32 2147483648, %v1082_v62  ;;  %v1092_v14 = vand.u32 2147483647, %v1082_v62  ;;  %vm1088_vm14 = vweird.f32 %v1082_v62 }
 0x576   :  { %v1095_v41 = vor.u32 1.1754944e-38, %v1094_v10  ;;  %vm1093_vm0 = vcmp.eq.f32.partialorder %v1092_v14, 8.507059e+37 }
 0x577   :  { %v1427_v2 = vpop.eup %1426 }
 0x578   :  { %v1122_v4 = vadd.f32 1.0, %v1427_v2 }
 0x57a   :  { %v1429_v5 = vpop.eup %1428  ;;  %1430 = vrcp.f32 %v1122_v4  ;;  %v1134_v25 = vand.u32 2147483648, %v1122_v4  ;;  %v1132_v29 = vand.u32 2147483647, %v1122_v4  ;;  %vm1128_vm3 = vweird.f32 %v1122_v4 }
 0x57b   :  { %v1084_v8 = vmul.f32 %v1429_v5, %v1082_v62  ;;  %vm1089_vm13 = vweird.f32 %v1429_v5 }
 0x57c   :  { %vm1090_vm15 = vmor %vm1088_vm14, %vm1089_vm13  ;;  %v1135_v1 = vor.u32 1.1754944e-38, %v1134_v25  ;;  %vm1133_vm5 = vcmp.eq.f32.partialorder %v1132_v29, 8.507059e+37 }
 0x57d   :  { %v1085_v34 = vsub.f32 1.0, %v1084_v8 }
 0x57f   :  { %v1086_v7 = vmul.f32 %v1429_v5, %v1085_v34 }
 0x580   :  { %v1431_v21 = vpop.eup %1430 }
 0x581   :  { %v1124_v27 = vmul.f32 %v1431_v21, %v1122_v4  ;;  %v1087_v22 = vadd.f32 %v1429_v5, %v1086_v7  ;;  %vm1129_vm2 = vweird.f32 %v1431_v21 }
 0x582   :  { %vm1130_vm4 = vmor %vm1128_vm3, %vm1129_vm2 }
 0x583   :  { %v1125_v42 = vsub.f32 1.0, %v1124_v27  ;;  %v1091_v43 = vsel %vm1090_vm15, %v1429_v5, %v1087_v22 }
 0x584   :  { %v1096_v32 = vsel %vm1093_vm0, %v1095_v41, %v1091_v43 }
 0x585   :  { %v1126_v47 = vmul.f32 %v1431_v21, %v1125_v42  ;;  %v1158_v35 = vmul.f32 %v1156_v31, %v1096_v32 }
 0x587   :  { %v1127_v48 = vadd.f32 %v1431_v21, %v1126_v47  ;;  %v1159_v0 = vadd.f32 %v1158_v35, %v265_v20 }
 0x589   :  { %v1131_v9 = vsel %vm1130_vm4, %v1431_v21, %v1127_v48  ;;  %1432 = vtanh.f32 %v1159_v0 }
 0x58a   :  { %v1136_v11 = vsel %vm1133_vm5, %v1135_v1, %v1131_v9 }
 0x58b   :  { %v1161_v15 = vsub.f32 1.0, %v1136_v11  ;;  %v1163_v38 = vmul.f32 %v1136_v11, %v1948_v53  ;;  %v1352_v53 = vld [vmem:[%s2042_s15] ss:$0 sm:$0xff] }
 0x58f   :  { %v1433_v17 = vpop.eup %1432 }
 0x590   :  { %v1162_v12 = vmul.f32 %v1433_v17, %v1161_v15 }
 0x592   :  { %v1164_v19 = vadd.f32 %v1163_v38, %v1162_v12 }
 0x594   :  { %1165 = vst.msk [vmem:[%s2046_s19] sm:$0xff] %vm281_vm1, %v1164_v19  ;;  %1340 = vmatmul.msk.f32.vlgmr.msrb.gmra.mxu0 %vm281_vm1, %v1164_v19 }
 0x611   :  { %v1194_v16 = vpop.f32.mrf.mxu0 }
 0x612   :  { %v1195_v51 = vadd.f32 %v1351_v3, %v1194_v16 }
 0x614   :  { %vm1197_vm6 = vcmp.gt.f32.partialorder %v1195_v51, 0.0  ;;  %v1198_v26 = vmul.f32 0.01, %v1195_v51 }
 0x616   :  { %v1199_v40 = vsel %vm1197_vm6, %v1195_v51, %v1198_v26 }
 0x617   :  { %1341 = vmatmul.msk.f32.vlgmr.msrb.gmra.mxu1 %vm281_vm1, %v1199_v40 }
 0x694   :  { %v1228_v45 = vpop.f32.mrf.mxu1 }
 0x695   :  { %v1229_v36 = vadd.f32 %v1352_v53, %v1228_v45 }
 0x697   :  { %vm1231_vm7 = vcmp.gt.f32.partialorder %v1229_v36, 0.0  ;;  %v1232_v24 = vmul.f32 0.01, %v1229_v36 }
 0x699   :  { %v1233_v54 = vsel %vm1231_vm7, %v1229_v36, %v1232_v24 }
 0x69a   :  { %1342 = vmatmul.msk.f32.vlgmr.msrb.gmra.mxu2 %vm281_vm1, %v1233_v54 }
 0x71d   :  { %v1262_v30 = vpop.f32.mrf.mxu2 }
 0x71e   :  { %v1263_v56 = vadd.f32 %v1353_v55, %v1262_v30 }
 0x720   :  { %1265 = vst [vmem:[%s2045_s18] sm:$0xff] %v1263_v56 }
 0x721   :  { %1274 = vsyncpa [#allocation3], 1 }
 0x722   :  { %1275 = vsyncpa [#allocation5], 1 }

</bundles_post_ra>
